<compile_context>
chip_gen: v6e
topology: v6e:2x2x1
jax: 0.10.0
libtpu: 0.0.40
codegen_flags: <defaults>
</compile_context>

<pallas_src>
import numpy as np
import jax
import jax.numpy as jnp
from jax.experimental import pallas as pl
from jax.experimental.pallas import tpu as pltpu

# ---- "config" (small, but consistent with the module) ----------------------
B = 2                      # batch
S = 8                      # sequence length
H = 32                     # hidden_size
NUM_HEADS = 4              # num_attention_heads
HEAD_DIM = H // NUM_HEADS
INTER = 64                 # intermediate_size
NUM_BUCKETS = 32           # num_buckets
MAX_DISTANCE = 16          # max_bucket_distance
LORA_R = 4                 # lora_rank
LORA_SCALE = 1.0 / LORA_R  # lora_alpha(=1) / r
LN_EPS = 1e-5

XPROJ = 3 * H + 2 * NUM_HEADS   # fused projection width: q | k | v | gate-logits
BIAS_LANES = 128                # lane width of the packed bias slab


# ---- in-kernel helpers ------------------------------------------------------
def _erf(x):
    # Abramowitz & Stegun 7.1.26 polynomial (|err| < 1.5e-7); keeps exact-GELU
    # semantics to f32 eps without relying on a lax.erf lowering in Mosaic.
    a1, a2, a3, a4, a5 = 0.254829592, -0.284496736, 1.421413741, -1.453152027, 1.061405429
    p = 0.3275911
    sgn = jnp.where(x >= 0.0, 1.0, -1.0).astype(jnp.float32)
    ax = jnp.abs(x)
    # exact divide kept here (approx reciprocal would eat into the 1e-4 check margin)
    t = 1.0 / (1.0 + p * ax)
    poly = ((((a5 * t + a4) * t + a3) * t + a2) * t + a1) * t
    return sgn * (1.0 - poly * jnp.exp(-ax * ax))


def _gelu(x):
    return 0.5 * x * (1.0 + _erf(x * jnp.float32(0.70710678118654752440)))


def _layer_norm(x, g, b):
    mean = jnp.mean(x, axis=-1, keepdims=True)
    var = jnp.mean((x - mean) ** 2, axis=-1, keepdims=True)
    return (x - mean) * jax.lax.rsqrt(var + LN_EPS) * g + b


# ---- the Pallas kernel: whole encoder layer in one invocation ---------------
def wavlm_layer_kernel(x_ref, wx_ref, w1p_ref, wb_ref, bias_ref, pos_ref, out_ref):
    x = x_ref[...]                                     # (B*S, H) f32
    bias = bias_ref[...]                               # (9, 128) packed bias slab
    scale = jnp.float32(HEAD_DIM ** -0.5)

    # fused q | k | v | gate-logit projection: one MXU push for all of it
    xp = (jnp.dot(x, wx_ref[...], preferred_element_type=jnp.float32)
          + bias[0:1, 0:XPROJ])                        # (B*S, XPROJ)
    q = xp[:, 0:H] * scale
    k = xp[:, H:2 * H]
    v = xp[:, 2 * H:3 * H]

    # gated relative-position-bias gate, all heads at once (gate logits were
    # pre-reduced into 2 columns per head by the wrapper).
    g = jax.nn.sigmoid(xp[:, 3 * H:XPROJ])             # (B*S, 2*NUM_HEADS)
    gru = bias[8:9, 0:NUM_HEADS]                       # (1, NUM_HEADS)
    gate = g[:, 0:NUM_HEADS] * (g[:, NUM_HEADS:] * gru - 1.0) + 2.0   # (B*S, NH)

    # attention: one (S,S) block per (batch, head); output projection hoisted out.
    # TODO(synk): attention_mask / output_attentions paths not implemented
    #             (module called with attention_mask=None in eval mode).
    batch_ctx = []
    for b in range(B):                                 # tiny, fully unrolled
        r0 = b * S
        head_ctx = []
        for h in range(NUM_HEADS):
            c0 = h * HEAD_DIM
            qh = q[r0:r0 + S, c0:c0 + HEAD_DIM]
            kh = k[r0:r0 + S, c0:c0 + HEAD_DIM]
            vh = v[r0:r0 + S, c0:c0 + HEAD_DIM]
            s = (jnp.dot(qh, kh.T, preferred_element_type=jnp.float32)
                 + gate[r0:r0 + S, h:h + 1] * pos_ref[h])            # (S, S)
            s = s - jnp.max(s, axis=-1, keepdims=True)
            e = jnp.exp(s)
            p = e * pl.reciprocal(jnp.sum(e, axis=-1, keepdims=True), approx=True)
            head_ctx.append(jnp.dot(p, vh, preferred_element_type=jnp.float32))
        batch_ctx.append(jnp.concatenate(head_ctx, axis=1))          # (S, H)
    ctx = jnp.concatenate(batch_ctx, axis=0)                         # (B*S, H)

    wb_all = wb_ref[...]                               # (H+INTER, H) = [Wo^T ; W2']
    attn_out = (jnp.dot(ctx, wb_all[0:H, :], preferred_element_type=jnp.float32)
                + bias[1:2, 0:H])

    # residual + LayerNorm (dropouts are eval-mode identities)
    h1 = x + attn_out
    ln1 = _layer_norm(h1, bias[2:3, 0:H], bias[3:4, 0:H])

    # feed-forward (LoRA already folded into w1p / w2' by the wrapper)
    inter = (jnp.dot(ln1, w1p_ref[...], preferred_element_type=jnp.float32)
             + bias[4:5, 0:INTER])
    act = _gelu(inter)
    ff = (jnp.dot(act, wb_all[H:H + INTER, :], preferred_element_type=jnp.float32)
          + bias[5:6, 0:H])

    h2 = ln1 + ff
    out_ref[...] = _layer_norm(h2, bias[6:7, 0:H], bias[7:8, 0:H]).astype(out_ref.dtype)


# ---- glue: relative position bias table (computed once, shared by all batches) ----
def compute_position_bias(rel_attn_embed, seq_len):
    ctx_pos = jnp.arange(seq_len)[:, None]
    mem_pos = jnp.arange(seq_len)[None, :]
    rel_pos = mem_pos - ctx_pos
    num_buckets = NUM_BUCKETS // 2
    rel_buckets = (rel_pos > 0).astype(jnp.int32) * num_buckets
    rel_pos = jnp.abs(rel_pos)
    max_exact = num_buckets // 2
    is_small = rel_pos < max_exact
    rp_f = jnp.maximum(rel_pos, 1).astype(jnp.float32)
    rel_large = (jnp.log(rp_f / max_exact) / np.log(MAX_DISTANCE / max_exact)
                 * (num_buckets - max_exact))
    rel_large = (max_exact + rel_large).astype(jnp.int32)
    rel_large = jnp.minimum(rel_large, num_buckets - 1)
    rel_buckets = rel_buckets + jnp.where(is_small, rel_pos, rel_large)
    values = rel_attn_embed[rel_buckets]                              # (S, S, num_heads)
    return jnp.transpose(values, (2, 0, 1)).astype(jnp.float32)       # (num_heads, S, S)


# ---- wrapper: weight fusion / packing + pallas_call -------------------------
def wavlm_encoder_layer(hidden_states, params, position_bias=None):
    Bn, Sn, Hn = hidden_states.shape
    if position_bias is None:
        position_bias = compute_position_bias(params["rel_attn_embed"], Sn)

    f32 = jnp.float32

    # fold LoRA adapters into the dense FFN weights (static per call)
    w1p = params["w1"].T.astype(f32) + LORA_SCALE * (params["a1"].T @ params["B1"].T)  # (H, INTER)
    w2p = params["w2"].T.astype(f32) + LORA_SCALE * (params["a2"].T @ params["B2"].T)  # (INTER, H)

    # pre-reduce the gate projection: ga/gb logits are linear in x_h, so the
    # sum over 4 output features folds into the weight/bias.
    wg_t = params["wg"].T.astype(f32)                   # (HEAD_DIM, 8)
    wga = wg_t[:, 0:4].sum(axis=1)                      # (HEAD_DIM,)
    wgb = wg_t[:, 4:8].sum(axis=1)
    wgate = jnp.zeros((Hn, 2 * NUM_HEADS), f32)
    for h in range(NUM_HEADS):
        sl = slice(h * HEAD_DIM, (h + 1) * HEAD_DIM)
        wgate = wgate.at[sl, h].set(wga)
        wgate = wgate.at[sl, NUM_HEADS + h].set(wgb)
    bga = params["bg"][0:4].sum()
    bgb = params["bg"][4:8].sum()
    gbias = jnp.concatenate([jnp.full((NUM_HEADS,), bga, f32),
                             jnp.full((NUM_HEADS,), bgb, f32)])

    # fused x-projection: [Wq^T | Wk^T | Wv^T | Wgate]  -> one matmul in-kernel
    wx = jnp.concatenate([params["wq"].T, params["wk"].T, params["wv"].T, wgate],
                         axis=1).astype(f32)            # (H, XPROJ)
    bx = jnp.concatenate([params["bq"], params["bk"], params["bv"], gbias]).astype(f32)

    # stacked "second operand" weights: [Wo^T ; W2']  (both have H output columns)
    wb = jnp.concatenate([params["wo"].T.astype(f32), w2p], axis=0)   # (H+INTER, H)

    # pack all small vectors (biases, LN params, gru const) into one (9,128) slab
    def row(v):
        v = jnp.asarray(v, f32).reshape(-1)
        return jnp.pad(v, (0, BIAS_LANES - v.shape[0]))[None, :]
    bslab = jnp.concatenate([
        row(bx),                  # row 0: fused qkv+gate bias      (XPROJ)
        row(params["bo"]),        # row 1: out_proj bias            (H)
        row(params["ln1_g"]),     # row 2
        row(params["ln1_b"]),     # row 3
        row(params["b1"]),        # row 4: intermediate bias        (INTER)
        row(params["b2"]),        # row 5: output_dense bias        (H)
        row(params["ln2_g"]),     # row 6
        row(params["ln2_b"]),     # row 7
        row(params["gru_const"]), # row 8: gru_rel_pos_const        (NUM_HEADS)
    ], axis=0)                    # (9, 128)

    x2d = hidden_states.reshape(Bn * Sn, Hn)
    pos = position_bias.astype(f32)

    def full(shape):
        nd = len(shape)
        return pl.BlockSpec(shape, lambda i, _nd=nd: (0,) * _nd)

    out2d = pl.pallas_call(
        wavlm_layer_kernel,
        out_shape=jax.ShapeDtypeStruct((Bn * Sn, Hn), hidden_states.dtype),
        grid=(1,),
        in_specs=[full(x2d.shape), full(wx.shape), full(w1p.shape),
                  full(wb.shape), full(bslab.shape), full(pos.shape)],
        out_specs=full((Bn * Sn, Hn)),
        compiler_params=pltpu.CompilerParams(dimension_semantics=("arbitrary",)),
    )(x2d, wx, w1p, wb, bslab, pos)

    return out2d.reshape(Bn, Sn, Hn), position_bias


# ---- pure-JAX reference (mirrors the PyTorch forward, LoRA kept explicit) ----
def layer_norm_ref(x, g, b):
    mean = jnp.mean(x, axis=-1, keepdims=True)
    var = jnp.mean((x - mean) ** 2, axis=-1, keepdims=True)
    return (x - mean) / jnp.sqrt(var + LN_EPS) * g + b


def reference_forward(x, p, position_bias):
    Bn, Sn, Hn = x.shape
    scale = HEAD_DIM ** -0.5
    lin = lambda a, w, b: a @ w.T + b
    split = lambda a: a.reshape(Bn, Sn, NUM_HEADS, HEAD_DIM).transpose(0, 2, 1, 3)
    q, k, v = (split(lin(x, p["wq"], p["bq"])),
               split(lin(x, p["wk"], p["bk"])),
               split(lin(x, p["wv"], p["bv"])))
    ghs = split(x)
    rp = (ghs @ p["wg"].T + p["bg"]).reshape(Bn, NUM_HEADS, Sn, 2, 4).sum(-1)
    g = jax.nn.sigmoid(rp)
    gate = g[..., 0:1] * (g[..., 1:2] * p["gru_const"].reshape(1, NUM_HEADS, 1, 1) - 1.0) + 2.0
    scores = jnp.einsum("bhqd,bhkd->bhqk", q * scale, k) + gate * position_bias[None]
    probs = jax.nn.softmax(scores, axis=-1)
    ctx = jnp.einsum("bhqk,bhkd->bhqd", probs, v).transpose(0, 2, 1, 3).reshape(Bn, Sn, Hn)
    attn_out = ctx @ p["wo"].T + p["bo"]
    h1 = x + attn_out
    ln1 = layer_norm_ref(h1, p["ln1_g"], p["ln1_b"])
    inter = ln1 @ p["w1"].T + p["b1"] + LORA_SCALE * (ln1 @ p["a1"].T) @ p["B1"].T
    act = jax.nn.gelu(inter, approximate=False)
    ff = act @ p["w2"].T + p["b2"] + LORA_SCALE * (act @ p["a2"].T) @ p["B2"].T
    return layer_norm_ref(ln1 + ff, p["ln2_g"], p["ln2_b"])


# ---- main -------------------------------------------------------------------
if __name__ == "__main__":
    key = jax.random.PRNGKey(0)
    ks = jax.random.split(key, 24)
    n = lambda kk, shp, s=0.02: s * jax.random.normal(kk, shp, dtype=jnp.float32)

    params = {
        "wq": n(ks[0], (H, H)), "bq": n(ks[1], (H,)),
        "wk": n(ks[2], (H, H)), "bk": n(ks[3], (H,)),
        "wv": n(ks[4], (H, H)), "bv": n(ks[5], (H,)),
        "wo": n(ks[6], (H, H)), "bo": n(ks[7], (H,)),
        "wg": n(ks[8], (8, HEAD_DIM), 0.1), "bg": n(ks[9], (8,), 0.1),
        "gru_const": jnp.ones((NUM_HEADS,), jnp.float32),
        "rel_attn_embed": n(ks[10], (NUM_BUCKETS, NUM_HEADS), 0.1),
        "ln1_g": jnp.ones((H,), jnp.float32), "ln1_b": jnp.zeros((H,), jnp.float32),
        "ln2_g": jnp.ones((H,), jnp.float32), "ln2_b": jnp.zeros((H,), jnp.float32),
        "w1": n(ks[11], (INTER, H)), "b1": n(ks[12], (INTER,)),
        # LoRA B is zero at real init; use small non-zero values so the LoRA path matters.
        "a1": n(ks[13], (LORA_R, H), 0.1), "B1": n(ks[14], (INTER, LORA_R), 0.05),
        "w2": n(ks[15], (H, INTER)), "b2": n(ks[16], (H,)),
        "a2": n(ks[17], (LORA_R, INTER), 0.1), "B2": n(ks[18], (H, LORA_R), 0.05),
    }
    x = jax.random.normal(ks[19], (B, S, H), dtype=jnp.float32)

    out, pos_bias = wavlm_encoder_layer(x, params)
    out = jax.block_until_ready(out)

    ref = reference_forward(x, params, pos_bias)
    np.testing.assert_allclose(np.asarray(out), np.asarray(ref), rtol=1e-4, atol=1e-4)
    print("KERNEL_OK")
</pallas_src>

<mosaic_0001>
module attributes {stable_mosaic.version = 11 : i64} {
  func.func @wavlm_layer_kernel(%arg0: i32, %arg1: memref<16x32xf32, #tpu.memory_space<vmem>>, %arg2: memref<32x104xf32, #tpu.memory_space<vmem>>, %arg3: memref<32x64xf32, #tpu.memory_space<vmem>>, %arg4: memref<96x32xf32, #tpu.memory_space<vmem>>, %arg5: memref<9x128xf32, #tpu.memory_space<vmem>>, %arg6: memref<4x8x8xf32, #tpu.memory_space<vmem>>, %arg7: memref<16x32xf32, #tpu.memory_space<vmem>>) attributes {dimension_semantics = [#tpu.dimension_semantics<arbitrary>], iteration_bounds = array<i64: 1>, scalar_prefetch = 0 : i64, scratch_operands = 0 : i64, tpu.core_type = #tpu.core_type<tc>, window_params = [{pipeline_mode = #tpu.pipeline_mode<synchronous>, transform_indices = @transform_0, window_bounds = array<i64: 16, 32>}, {pipeline_mode = #tpu.pipeline_mode<synchronous>, transform_indices = @transform_1, window_bounds = array<i64: 32, 104>}, {pipeline_mode = #tpu.pipeline_mode<synchronous>, transform_indices = @transform_2, window_bounds = array<i64: 32, 64>}, {pipeline_mode = #tpu.pipeline_mode<synchronous>, transform_indices = @transform_3, window_bounds = array<i64: 96, 32>}, {pipeline_mode = #tpu.pipeline_mode<synchronous>, transform_indices = @transform_4, window_bounds = array<i64: 9, 128>}, {pipeline_mode = #tpu.pipeline_mode<synchronous>, transform_indices = @transform_5, window_bounds = array<i64: 4, 8, 8>}, {pipeline_mode = #tpu.pipeline_mode<synchronous>, transform_indices = @transform_6, window_bounds = array<i64: 16, 32>}]} {
    %c0 = arith.constant 0 : index
    %c0_0 = arith.constant 0 : index
    %0 = vector.load %arg1[%c0, %c0_0] : memref<16x32xf32, #tpu.memory_space<vmem>>, vector<16x32xf32>
    %c0_1 = arith.constant 0 : index
    %c0_2 = arith.constant 0 : index
    %1 = vector.load %arg5[%c0_1, %c0_2] : memref<9x128xf32, #tpu.memory_space<vmem>>, vector<9x128xf32>
    %c0_3 = arith.constant 0 : index
    %c0_4 = arith.constant 0 : index
    %2 = vector.load %arg2[%c0_3, %c0_4] : memref<32x104xf32, #tpu.memory_space<vmem>>, vector<32x104xf32>
    %cst = arith.constant dense<0.000000e+00> : vector<16x104xf32>
    %3 = tpu.matmul %0, %2, %cst {dimension_numbers = #tpu.dot_dimension_numbers<[1], [0], [0], [1], [0, 0, 1, 1], [], []>} : vector<16x32xf32>, vector<32x104xf32>, vector<16x104xf32> -> vector<16x104xf32>
    %4 = vector.extract_strided_slice %1 {offsets = [0, 0], sizes = [1, 104], strides = [1, 1]} : vector<9x128xf32> to vector<1x104xf32>
    %5 = vector.broadcast %4 : vector<1x104xf32> to vector<16x104xf32>
    %6 = arith.addf %3, %5 : vector<16x104xf32>
    %7 = vector.extract_strided_slice %6 {offsets = [0, 0], sizes = [16, 32], strides = [1, 1]} : vector<16x104xf32> to vector<16x32xf32>
    %cst_5 = arith.constant 0.353553385 : f32
    %8 = vector.broadcast %cst_5 : f32 to vector<16x32xf32>
    %9 = arith.mulf %7, %8 : vector<16x32xf32>
    %10 = vector.extract_strided_slice %6 {offsets = [0, 32], sizes = [16, 32], strides = [1, 1]} : vector<16x104xf32> to vector<16x32xf32>
    %11 = vector.extract_strided_slice %6 {offsets = [0, 64], sizes = [16, 32], strides = [1, 1]} : vector<16x104xf32> to vector<16x32xf32>
    %12 = vector.extract_strided_slice %6 {offsets = [0, 96], sizes = [16, 8], strides = [1, 1]} : vector<16x104xf32> to vector<16x8xf32>
    %13 = arith.negf %12 : vector<16x8xf32>
    %14 = math.exp %13 : vector<16x8xf32>
    %cst_6 = arith.constant 1.000000e+00 : f32
    %15 = vector.broadcast %cst_6 : f32 to vector<16x8xf32>
    %16 = arith.addf %15, %14 : vector<16x8xf32>
    %17 = arith.divf %15, %16 : vector<16x8xf32>
    %18 = vector.extract_strided_slice %1 {offsets = [8, 0], sizes = [1, 4], strides = [1, 1]} : vector<9x128xf32> to vector<1x4xf32>
    %19 = vector.extract_strided_slice %17 {offsets = [0, 0], sizes = [16, 4], strides = [1, 1]} : vector<16x8xf32> to vector<16x4xf32>
    %20 = vector.extract_strided_slice %17 {offsets = [0, 4], sizes = [16, 4], strides = [1, 1]} : vector<16x8xf32> to vector<16x4xf32>
    %21 = vector.broadcast %18 : vector<1x4xf32> to vector<16x4xf32>
    %22 = arith.mulf %20, %21 : vector<16x4xf32>
    %cst_7 = arith.constant 1.000000e+00 : f32
    %23 = vector.broadcast %cst_7 : f32 to vector<16x4xf32>
    %24 = arith.subf %22, %23 : vector<16x4xf32>
    %25 = arith.mulf %19, %24 : vector<16x4xf32>
    %cst_8 = arith.constant 2.000000e+00 : f32
    %26 = vector.broadcast %cst_8 : f32 to vector<16x4xf32>
    %27 = arith.addf %25, %26 : vector<16x4xf32>
    %28 = vector.extract_strided_slice %9 {offsets = [0, 0], sizes = [8, 8], strides = [1, 1]} : vector<16x32xf32> to vector<8x8xf32>
    %29 = vector.extract_strided_slice %10 {offsets = [0, 0], sizes = [8, 8], strides = [1, 1]} : vector<16x32xf32> to vector<8x8xf32>
    %30 = vector.extract_strided_slice %11 {offsets = [0, 0], sizes = [8, 8], strides = [1, 1]} : vector<16x32xf32> to vector<8x8xf32>
    %31 = tpu.transpose %29, [1, 0] : vector<8x8xf32> -> vector<8x8xf32>
    %cst_9 = arith.constant dense<0.000000e+00> : vector<8x8xf32>
    %32 = tpu.matmul %28, %31, %cst_9 {dimension_numbers = #tpu.dot_dimension_numbers<[1], [0], [0], [1], [0, 0, 1, 1], [], []>} : vector<8x8xf32>, vector<8x8xf32>, vector<8x8xf32> -> vector<8x8xf32>
    %33 = vector.extract_strided_slice %27 {offsets = [0, 0], sizes = [8, 1], strides = [1, 1]} : vector<16x4xf32> to vector<8x1xf32>
    %c0_10 = arith.constant 0 : index
    %c0_11 = arith.constant 0 : index
    %c0_12 = arith.constant 0 : index
    %34 = vector.load %arg6[%c0_10, %c0_11, %c0_12] : memref<4x8x8xf32, #tpu.memory_space<vmem>>, vector<1x8x8xf32>
    %35 = vector.shape_cast %34 : vector<1x8x8xf32> to vector<8x8xf32>
    %36 = vector.broadcast %33 : vector<8x1xf32> to vector<8x8xf32>
    %37 = arith.mulf %36, %35 : vector<8x8xf32>
    %38 = arith.addf %32, %37 : vector<8x8xf32>
    %cst_13 = arith.constant dense<0xFF800000> : vector<8xf32>
    %39 = vector.multi_reduction <maximumf>, %38, %cst_13 [1] : vector<8x8xf32> to vector<8xf32>
    %40 = vector.shape_cast %39 : vector<8xf32> to vector<8x1xf32>
    %41 = vector.broadcast %40 : vector<8x1xf32> to vector<8x8xf32>
    %42 = arith.subf %38, %41 : vector<8x8xf32>
    %43 = math.exp %42 : vector<8x8xf32>
    %cst_14 = arith.constant dense<0.000000e+00> : vector<8xf32>
    %44 = vector.multi_reduction <add>, %43, %cst_14 [1] : vector<8x8xf32> to vector<8xf32>
    %45 = vector.shape_cast %44 : vector<8xf32> to vector<8x1xf32>
    %46 = tpu.reciprocal %45 {approx = true} : vector<8x1xf32> -> vector<8x1xf32>
    %47 = vector.broadcast %46 : vector<8x1xf32> to vector<8x8xf32>
    %48 = arith.mulf %43, %47 : vector<8x8xf32>
    %cst_15 = arith.constant dense<0.000000e+00> : vector<8x8xf32>
    %49 = tpu.matmul %48, %30, %cst_15 {dimension_numbers = #tpu.dot_dimension_numbers<[1], [0], [0], [1], [0, 0, 1, 1], [], []>} : vector<8x8xf32>, vector<8x8xf32>, vector<8x8xf32> -> vector<8x8xf32>
    %50 = vector.extract_strided_slice %9 {offsets = [0, 8], sizes = [8, 8], strides = [1, 1]} : vector<16x32xf32> to vector<8x8xf32>
    %51 = vector.extract_strided_slice %10 {offsets = [0, 8], sizes = [8, 8], strides = [1, 1]} : vector<16x32xf32> to vector<8x8xf32>
    %52 = vector.extract_strided_slice %11 {offsets = [0, 8], sizes = [8, 8], strides = [1, 1]} : vector<16x32xf32> to vector<8x8xf32>
    %53 = tpu.transpose %51, [1, 0] : vector<8x8xf32> -> vector<8x8xf32>
    %cst_16 = arith.constant dense<0.000000e+00> : vector<8x8xf32>
    %54 = tpu.matmul %50, %53, %cst_16 {dimension_numbers = #tpu.dot_dimension_numbers<[1], [0], [0], [1], [0, 0, 1, 1], [], []>} : vector<8x8xf32>, vector<8x8xf32>, vector<8x8xf32> -> vector<8x8xf32>
    %55 = vector.extract_strided_slice %27 {offsets = [0, 1], sizes = [8, 1], strides = [1, 1]} : vector<16x4xf32> to vector<8x1xf32>
    %c1 = arith.constant 1 : index
    %c0_17 = arith.constant 0 : index
    %c0_18 = arith.constant 0 : index
    %56 = vector.load %arg6[%c1, %c0_17, %c0_18] : memref<4x8x8xf32, #tpu.memory_space<vmem>>, vector<1x8x8xf32>
    %57 = vector.shape_cast %56 : vector<1x8x8xf32> to vector<8x8xf32>
    %58 = vector.broadcast %55 : vector<8x1xf32> to vector<8x8xf32>
    %59 = arith.mulf %58, %57 : vector<8x8xf32>
    %60 = arith.addf %54, %59 : vector<8x8xf32>
    %cst_19 = arith.constant dense<0xFF800000> : vector<8xf32>
    %61 = vector.multi_reduction <maximumf>, %60, %cst_19 [1] : vector<8x8xf32> to vector<8xf32>
    %62 = vector.shape_cast %61 : vector<8xf32> to vector<8x1xf32>
    %63 = vector.broadcast %62 : vector<8x1xf32> to vector<8x8xf32>
    %64 = arith.subf %60, %63 : vector<8x8xf32>
    %65 = math.exp %64 : vector<8x8xf32>
    %cst_20 = arith.constant dense<0.000000e+00> : vector<8xf32>
    %66 = vector.multi_reduction <add>, %65, %cst_20 [1] : vector<8x8xf32> to vector<8xf32>
    %67 = vector.shape_cast %66 : vector<8xf32> to vector<8x1xf32>
    %68 = tpu.reciprocal %67 {approx = true} : vector<8x1xf32> -> vector<8x1xf32>
    %69 = vector.broadcast %68 : vector<8x1xf32> to vector<8x8xf32>
    %70 = arith.mulf %65, %69 : vector<8x8xf32>
    %cst_21 = arith.constant dense<0.000000e+00> : vector<8x8xf32>
    %71 = tpu.matmul %70, %52, %cst_21 {dimension_numbers = #tpu.dot_dimension_numbers<[1], [0], [0], [1], [0, 0, 1, 1], [], []>} : vector<8x8xf32>, vector<8x8xf32>, vector<8x8xf32> -> vector<8x8xf32>
    %72 = vector.extract_strided_slice %9 {offsets = [0, 16], sizes = [8, 8], strides = [1, 1]} : vector<16x32xf32> to vector<8x8xf32>
    %73 = vector.extract_strided_slice %10 {offsets = [0, 16], sizes = [8, 8], strides = [1, 1]} : vector<16x32xf32> to vector<8x8xf32>
    %74 = vector.extract_strided_slice %11 {offsets = [0, 16], sizes = [8, 8], strides = [1, 1]} : vector<16x32xf32> to vector<8x8xf32>
    %75 = tpu.transpose %73, [1, 0] : vector<8x8xf32> -> vector<8x8xf32>
    %cst_22 = arith.constant dense<0.000000e+00> : vector<8x8xf32>
    %76 = tpu.matmul %72, %75, %cst_22 {dimension_numbers = #tpu.dot_dimension_numbers<[1], [0], [0], [1], [0, 0, 1, 1], [], []>} : vector<8x8xf32>, vector<8x8xf32>, vector<8x8xf32> -> vector<8x8xf32>
    %77 = vector.extract_strided_slice %27 {offsets = [0, 2], sizes = [8, 1], strides = [1, 1]} : vector<16x4xf32> to vector<8x1xf32>
    %c2 = arith.constant 2 : index
    %c0_23 = arith.constant 0 : index
    %c0_24 = arith.constant 0 : index
    %78 = vector.load %arg6[%c2, %c0_23, %c0_24] : memref<4x8x8xf32, #tpu.memory_space<vmem>>, vector<1x8x8xf32>
    %79 = vector.shape_cast %78 : vector<1x8x8xf32> to vector<8x8xf32>
    %80 = vector.broadcast %77 : vector<8x1xf32> to vector<8x8xf32>
    %81 = arith.mulf %80, %79 : vector<8x8xf32>
    %82 = arith.addf %76, %81 : vector<8x8xf32>
    %cst_25 = arith.constant dense<0xFF800000> : vector<8xf32>
    %83 = vector.multi_reduction <maximumf>, %82, %cst_25 [1] : vector<8x8xf32> to vector<8xf32>
    %84 = vector.shape_cast %83 : vector<8xf32> to vector<8x1xf32>
    %85 = vector.broadcast %84 : vector<8x1xf32> to vector<8x8xf32>
    %86 = arith.subf %82, %85 : vector<8x8xf32>
    %87 = math.exp %86 : vector<8x8xf32>
    %cst_26 = arith.constant dense<0.000000e+00> : vector<8xf32>
    %88 = vector.multi_reduction <add>, %87, %cst_26 [1] : vector<8x8xf32> to vector<8xf32>
    %89 = vector.shape_cast %88 : vector<8xf32> to vector<8x1xf32>
    %90 = tpu.reciprocal %89 {approx = true} : vector<8x1xf32> -> vector<8x1xf32>
    %91 = vector.broadcast %90 : vector<8x1xf32> to vector<8x8xf32>
    %92 = arith.mulf %87, %91 : vector<8x8xf32>
    %cst_27 = arith.constant dense<0.000000e+00> : vector<8x8xf32>
    %93 = tpu.matmul %92, %74, %cst_27 {dimension_numbers = #tpu.dot_dimension_numbers<[1], [0], [0], [1], [0, 0, 1, 1], [], []>} : vector<8x8xf32>, vector<8x8xf32>, vector<8x8xf32> -> vector<8x8xf32>
    %94 = vector.extract_strided_slice %9 {offsets = [0, 24], sizes = [8, 8], strides = [1, 1]} : vector<16x32xf32> to vector<8x8xf32>
    %95 = vector.extract_strided_slice %10 {offsets = [0, 24], sizes = [8, 8], strides = [1, 1]} : vector<16x32xf32> to vector<8x8xf32>
    %96 = vector.extract_strided_slice %11 {offsets = [0, 24], sizes = [8, 8], strides = [1, 1]} : vector<16x32xf32> to vector<8x8xf32>
    %97 = tpu.transpose %95, [1, 0] : vector<8x8xf32> -> vector<8x8xf32>
    %cst_28 = arith.constant dense<0.000000e+00> : vector<8x8xf32>
    %98 = tpu.matmul %94, %97, %cst_28 {dimension_numbers = #tpu.dot_dimension_numbers<[1], [0], [0], [1], [0, 0, 1, 1], [], []>} : vector<8x8xf32>, vector<8x8xf32>, vector<8x8xf32> -> vector<8x8xf32>
    %99 = vector.extract_strided_slice %27 {offsets = [0, 3], sizes = [8, 1], strides = [1, 1]} : vector<16x4xf32> to vector<8x1xf32>
    %c3 = arith.constant 3 : index
    %c0_29 = arith.constant 0 : index
    %c0_30 = arith.constant 0 : index
    %100 = vector.load %arg6[%c3, %c0_29, %c0_30] : memref<4x8x8xf32, #tpu.memory_space<vmem>>, vector<1x8x8xf32>
    %101 = vector.shape_cast %100 : vector<1x8x8xf32> to vector<8x8xf32>
    %102 = vector.broadcast %99 : vector<8x1xf32> to vector<8x8xf32>
    %103 = arith.mulf %102, %101 : vector<8x8xf32>
    %104 = arith.addf %98, %103 : vector<8x8xf32>
    %cst_31 = arith.constant dense<0xFF800000> : vector<8xf32>
    %105 = vector.multi_reduction <maximumf>, %104, %cst_31 [1] : vector<8x8xf32> to vector<8xf32>
    %106 = vector.shape_cast %105 : vector<8xf32> to vector<8x1xf32>
    %107 = vector.broadcast %106 : vector<8x1xf32> to vector<8x8xf32>
    %108 = arith.subf %104, %107 : vector<8x8xf32>
    %109 = math.exp %108 : vector<8x8xf32>
    %cst_32 = arith.constant dense<0.000000e+00> : vector<8xf32>
    %110 = vector.multi_reduction <add>, %109, %cst_32 [1] : vector<8x8xf32> to vector<8xf32>
    %111 = vector.shape_cast %110 : vector<8xf32> to vector<8x1xf32>
    %112 = tpu.reciprocal %111 {approx = true} : vector<8x1xf32> -> vector<8x1xf32>
    %113 = vector.broadcast %112 : vector<8x1xf32> to vector<8x8xf32>
    %114 = arith.mulf %109, %113 : vector<8x8xf32>
    %cst_33 = arith.constant dense<0.000000e+00> : vector<8x8xf32>
    %115 = tpu.matmul %114, %96, %cst_33 {dimension_numbers = #tpu.dot_dimension_numbers<[1], [0], [0], [1], [0, 0, 1, 1], [], []>} : vector<8x8xf32>, vector<8x8xf32>, vector<8x8xf32> -> vector<8x8xf32>
    %116 = tpu.concatenate %49, %71, %93, %115 in 1 : vector<8x8xf32>, vector<8x8xf32>, vector<8x8xf32>, vector<8x8xf32> -> vector<8x32xf32>
    %117 = vector.extract_strided_slice %9 {offsets = [8, 0], sizes = [8, 8], strides = [1, 1]} : vector<16x32xf32> to vector<8x8xf32>
    %118 = vector.extract_strided_slice %10 {offsets = [8, 0], sizes = [8, 8], strides = [1, 1]} : vector<16x32xf32> to vector<8x8xf32>
    %119 = vector.extract_strided_slice %11 {offsets = [8, 0], sizes = [8, 8], strides = [1, 1]} : vector<16x32xf32> to vector<8x8xf32>
    %120 = tpu.transpose %118, [1, 0] : vector<8x8xf32> -> vector<8x8xf32>
    %cst_34 = arith.constant dense<0.000000e+00> : vector<8x8xf32>
    %121 = tpu.matmul %117, %120, %cst_34 {dimension_numbers = #tpu.dot_dimension_numbers<[1], [0], [0], [1], [0, 0, 1, 1], [], []>} : vector<8x8xf32>, vector<8x8xf32>, vector<8x8xf32> -> vector<8x8xf32>
    %122 = vector.extract_strided_slice %27 {offsets = [8, 0], sizes = [8, 1], strides = [1, 1]} : vector<16x4xf32> to vector<8x1xf32>
    %c0_35 = arith.constant 0 : index
    %c0_36 = arith.constant 0 : index
    %c0_37 = arith.constant 0 : index
    %123 = vector.load %arg6[%c0_35, %c0_36, %c0_37] : memref<4x8x8xf32, #tpu.memory_space<vmem>>, vector<1x8x8xf32>
    %124 = vector.shape_cast %123 : vector<1x8x8xf32> to vector<8x8xf32>
    %125 = vector.broadcast %122 : vector<8x1xf32> to vector<8x8xf32>
    %126 = arith.mulf %125, %124 : vector<8x8xf32>
    %127 = arith.addf %121, %126 : vector<8x8xf32>
    %cst_38 = arith.constant dense<0xFF800000> : vector<8xf32>
    %128 = vector.multi_reduction <maximumf>, %127, %cst_38 [1] : vector<8x8xf32> to vector<8xf32>
    %129 = vector.shape_cast %128 : vector<8xf32> to vector<8x1xf32>
    %130 = vector.broadcast %129 : vector<8x1xf32> to vector<8x8xf32>
    %131 = arith.subf %127, %130 : vector<8x8xf32>
    %132 = math.exp %131 : vector<8x8xf32>
    %cst_39 = arith.constant dense<0.000000e+00> : vector<8xf32>
    %133 = vector.multi_reduction <add>, %132, %cst_39 [1] : vector<8x8xf32> to vector<8xf32>
    %134 = vector.shape_cast %133 : vector<8xf32> to vector<8x1xf32>
    %135 = tpu.reciprocal %134 {approx = true} : vector<8x1xf32> -> vector<8x1xf32>
    %136 = vector.broadcast %135 : vector<8x1xf32> to vector<8x8xf32>
    %137 = arith.mulf %132, %136 : vector<8x8xf32>
    %cst_40 = arith.constant dense<0.000000e+00> : vector<8x8xf32>
    %138 = tpu.matmul %137, %119, %cst_40 {dimension_numbers = #tpu.dot_dimension_numbers<[1], [0], [0], [1], [0, 0, 1, 1], [], []>} : vector<8x8xf32>, vector<8x8xf32>, vector<8x8xf32> -> vector<8x8xf32>
    %139 = vector.extract_strided_slice %9 {offsets = [8, 8], sizes = [8, 8], strides = [1, 1]} : vector<16x32xf32> to vector<8x8xf32>
    %140 = vector.extract_strided_slice %10 {offsets = [8, 8], sizes = [8, 8], strides = [1, 1]} : vector<16x32xf32> to vector<8x8xf32>
    %141 = vector.extract_strided_slice %11 {offsets = [8, 8], sizes = [8, 8], strides = [1, 1]} : vector<16x32xf32> to vector<8x8xf32>
    %142 = tpu.transpose %140, [1, 0] : vector<8x8xf32> -> vector<8x8xf32>
    %cst_41 = arith.constant dense<0.000000e+00> : vector<8x8xf32>
    %143 = tpu.matmul %139, %142, %cst_41 {dimension_numbers = #tpu.dot_dimension_numbers<[1], [0], [0], [1], [0, 0, 1, 1], [], []>} : vector<8x8xf32>, vector<8x8xf32>, vector<8x8xf32> -> vector<8x8xf32>
    %144 = vector.extract_strided_slice %27 {offsets = [8, 1], sizes = [8, 1], strides = [1, 1]} : vector<16x4xf32> to vector<8x1xf32>
    %c1_42 = arith.constant 1 : index
    %c0_43 = arith.constant 0 : index
    %c0_44 = arith.constant 0 : index
    %145 = vector.load %arg6[%c1_42, %c0_43, %c0_44] : memref<4x8x8xf32, #tpu.memory_space<vmem>>, vector<1x8x8xf32>
    %146 = vector.shape_cast %145 : vector<1x8x8xf32> to vector<8x8xf32>
    %147 = vector.broadcast %144 : vector<8x1xf32> to vector<8x8xf32>
    %148 = arith.mulf %147, %146 : vector<8x8xf32>
    %149 = arith.addf %143, %148 : vector<8x8xf32>
    %cst_45 = arith.constant dense<0xFF800000> : vector<8xf32>
    %150 = vector.multi_reduction <maximumf>, %149, %cst_45 [1] : vector<8x8xf32> to vector<8xf32>
    %151 = vector.shape_cast %150 : vector<8xf32> to vector<8x1xf32>
    %152 = vector.broadcast %151 : vector<8x1xf32> to vector<8x8xf32>
    %153 = arith.subf %149, %152 : vector<8x8xf32>
    %154 = math.exp %153 : vector<8x8xf32>
    %cst_46 = arith.constant dense<0.000000e+00> : vector<8xf32>
    %155 = vector.multi_reduction <add>, %154, %cst_46 [1] : vector<8x8xf32> to vector<8xf32>
    %156 = vector.shape_cast %155 : vector<8xf32> to vector<8x1xf32>
    %157 = tpu.reciprocal %156 {approx = true} : vector<8x1xf32> -> vector<8x1xf32>
    %158 = vector.broadcast %157 : vector<8x1xf32> to vector<8x8xf32>
    %159 = arith.mulf %154, %158 : vector<8x8xf32>
    %cst_47 = arith.constant dense<0.000000e+00> : vector<8x8xf32>
    %160 = tpu.matmul %159, %141, %cst_47 {dimension_numbers = #tpu.dot_dimension_numbers<[1], [0], [0], [1], [0, 0, 1, 1], [], []>} : vector<8x8xf32>, vector<8x8xf32>, vector<8x8xf32> -> vector<8x8xf32>
    %161 = vector.extract_strided_slice %9 {offsets = [8, 16], sizes = [8, 8], strides = [1, 1]} : vector<16x32xf32> to vector<8x8xf32>
    %162 = vector.extract_strided_slice %10 {offsets = [8, 16], sizes = [8, 8], strides = [1, 1]} : vector<16x32xf32> to vector<8x8xf32>
    %163 = vector.extract_strided_slice %11 {offsets = [8, 16], sizes = [8, 8], strides = [1, 1]} : vector<16x32xf32> to vector<8x8xf32>
    %164 = tpu.transpose %162, [1, 0] : vector<8x8xf32> -> vector<8x8xf32>
    %cst_48 = arith.constant dense<0.000000e+00> : vector<8x8xf32>
    %165 = tpu.matmul %161, %164, %cst_48 {dimension_numbers = #tpu.dot_dimension_numbers<[1], [0], [0], [1], [0, 0, 1, 1], [], []>} : vector<8x8xf32>, vector<8x8xf32>, vector<8x8xf32> -> vector<8x8xf32>
    %166 = vector.extract_strided_slice %27 {offsets = [8, 2], sizes = [8, 1], strides = [1, 1]} : vector<16x4xf32> to vector<8x1xf32>
    %c2_49 = arith.constant 2 : index
    %c0_50 = arith.constant 0 : index
    %c0_51 = arith.constant 0 : index
    %167 = vector.load %arg6[%c2_49, %c0_50, %c0_51] : memref<4x8x8xf32, #tpu.memory_space<vmem>>, vector<1x8x8xf32>
    %168 = vector.shape_cast %167 : vector<1x8x8xf32> to vector<8x8xf32>
    %169 = vector.broadcast %166 : vector<8x1xf32> to vector<8x8xf32>
    %170 = arith.mulf %169, %168 : vector<8x8xf32>
    %171 = arith.addf %165, %170 : vector<8x8xf32>
    %cst_52 = arith.constant dense<0xFF800000> : vector<8xf32>
    %172 = vector.multi_reduction <maximumf>, %171, %cst_52 [1] : vector<8x8xf32> to vector<8xf32>
    %173 = vector.shape_cast %172 : vector<8xf32> to vector<8x1xf32>
    %174 = vector.broadcast %173 : vector<8x1xf32> to vector<8x8xf32>
    %175 = arith.subf %171, %174 : vector<8x8xf32>
    %176 = math.exp %175 : vector<8x8xf32>
    %cst_53 = arith.constant dense<0.000000e+00> : vector<8xf32>
    %177 = vector.multi_reduction <add>, %176, %cst_53 [1] : vector<8x8xf32> to vector<8xf32>
    %178 = vector.shape_cast %177 : vector<8xf32> to vector<8x1xf32>
    %179 = tpu.reciprocal %178 {approx = true} : vector<8x1xf32> -> vector<8x1xf32>
    %180 = vector.broadcast %179 : vector<8x1xf32> to vector<8x8xf32>
    %181 = arith.mulf %176, %180 : vector<8x8xf32>
    %cst_54 = arith.constant dense<0.000000e+00> : vector<8x8xf32>
    %182 = tpu.matmul %181, %163, %cst_54 {dimension_numbers = #tpu.dot_dimension_numbers<[1], [0], [0], [1], [0, 0, 1, 1], [], []>} : vector<8x8xf32>, vector<8x8xf32>, vector<8x8xf32> -> vector<8x8xf32>
    %183 = vector.extract_strided_slice %9 {offsets = [8, 24], sizes = [8, 8], strides = [1, 1]} : vector<16x32xf32> to vector<8x8xf32>
    %184 = vector.extract_strided_slice %10 {offsets = [8, 24], sizes = [8, 8], strides = [1, 1]} : vector<16x32xf32> to vector<8x8xf32>
    %185 = vector.extract_strided_slice %11 {offsets = [8, 24], sizes = [8, 8], strides = [1, 1]} : vector<16x32xf32> to vector<8x8xf32>
    %186 = tpu.transpose %184, [1, 0] : vector<8x8xf32> -> vector<8x8xf32>
    %cst_55 = arith.constant dense<0.000000e+00> : vector<8x8xf32>
    %187 = tpu.matmul %183, %186, %cst_55 {dimension_numbers = #tpu.dot_dimension_numbers<[1], [0], [0], [1], [0, 0, 1, 1], [], []>} : vector<8x8xf32>, vector<8x8xf32>, vector<8x8xf32> -> vector<8x8xf32>
    %188 = vector.extract_strided_slice %27 {offsets = [8, 3], sizes = [8, 1], strides = [1, 1]} : vector<16x4xf32> to vector<8x1xf32>
    %c3_56 = arith.constant 3 : index
    %c0_57 = arith.constant 0 : index
    %c0_58 = arith.constant 0 : index
    %189 = vector.load %arg6[%c3_56, %c0_57, %c0_58] : memref<4x8x8xf32, #tpu.memory_space<vmem>>, vector<1x8x8xf32>
    %190 = vector.shape_cast %189 : vector<1x8x8xf32> to vector<8x8xf32>
    %191 = vector.broadcast %188 : vector<8x1xf32> to vector<8x8xf32>
    %192 = arith.mulf %191, %190 : vector<8x8xf32>
    %193 = arith.addf %187, %192 : vector<8x8xf32>
    %cst_59 = arith.constant dense<0xFF800000> : vector<8xf32>
    %194 = vector.multi_reduction <maximumf>, %193, %cst_59 [1] : vector<8x8xf32> to vector<8xf32>
    %195 = vector.shape_cast %194 : vector<8xf32> to vector<8x1xf32>
    %196 = vector.broadcast %195 : vector<8x1xf32> to vector<8x8xf32>
    %197 = arith.subf %193, %196 : vector<8x8xf32>
    %198 = math.exp %197 : vector<8x8xf32>
    %cst_60 = arith.constant dense<0.000000e+00> : vector<8xf32>
    %199 = vector.multi_reduction <add>, %198, %cst_60 [1] : vector<8x8xf32> to vector<8xf32>
    %200 = vector.shape_cast %199 : vector<8xf32> to vector<8x1xf32>
    %201 = tpu.reciprocal %200 {approx = true} : vector<8x1xf32> -> vector<8x1xf32>
    %202 = vector.broadcast %201 : vector<8x1xf32> to vector<8x8xf32>
    %203 = arith.mulf %198, %202 : vector<8x8xf32>
    %cst_61 = arith.constant dense<0.000000e+00> : vector<8x8xf32>
    %204 = tpu.matmul %203, %185, %cst_61 {dimension_numbers = #tpu.dot_dimension_numbers<[1], [0], [0], [1], [0, 0, 1, 1], [], []>} : vector<8x8xf32>, vector<8x8xf32>, vector<8x8xf32> -> vector<8x8xf32>
    %205 = tpu.concatenate %138, %160, %182, %204 in 1 : vector<8x8xf32>, vector<8x8xf32>, vector<8x8xf32>, vector<8x8xf32> -> vector<8x32xf32>
    %206 = tpu.concatenate %116, %205 in 0 : vector<8x32xf32>, vector<8x32xf32> -> vector<16x32xf32>
    %c0_62 = arith.constant 0 : index
    %c0_63 = arith.constant 0 : index
    %207 = vector.load %arg4[%c0_62, %c0_63] : memref<96x32xf32, #tpu.memory_space<vmem>>, vector<96x32xf32>
    %208 = vector.extract_strided_slice %207 {offsets = [0, 0], sizes = [32, 32], strides = [1, 1]} : vector<96x32xf32> to vector<32x32xf32>
    %cst_64 = arith.constant dense<0.000000e+00> : vector<16x32xf32>
    %209 = tpu.matmul %206, %208, %cst_64 {dimension_numbers = #tpu.dot_dimension_numbers<[1], [0], [0], [1], [0, 0, 1, 1], [], []>} : vector<16x32xf32>, vector<32x32xf32>, vector<16x32xf32> -> vector<16x32xf32>
    %210 = vector.extract_strided_slice %1 {offsets = [1, 0], sizes = [1, 32], strides = [1, 1]} : vector<9x128xf32> to vector<1x32xf32>
    %211 = vector.broadcast %210 : vector<1x32xf32> to vector<16x32xf32>
    %212 = arith.addf %209, %211 : vector<16x32xf32>
    %213 = arith.addf %0, %212 : vector<16x32xf32>
    %214 = vector.extract_strided_slice %1 {offsets = [2, 0], sizes = [1, 32], strides = [1, 1]} : vector<9x128xf32> to vector<1x32xf32>
    %215 = vector.extract_strided_slice %1 {offsets = [3, 0], sizes = [1, 32], strides = [1, 1]} : vector<9x128xf32> to vector<1x32xf32>
    %cst_65 = arith.constant dense<0.000000e+00> : vector<16xf32>
    %216 = vector.multi_reduction <add>, %213, %cst_65 [1] : vector<16x32xf32> to vector<16xf32>
    %217 = vector.shape_cast %216 : vector<16xf32> to vector<16x1xf32>
    %cst_66 = arith.constant 3.200000e+01 : f32
    %218 = vector.broadcast %cst_66 : f32 to vector<16x1xf32>
    %219 = arith.divf %217, %218 : vector<16x1xf32>
    %220 = vector.broadcast %219 : vector<16x1xf32> to vector<16x32xf32>
    %221 = arith.subf %213, %220 : vector<16x32xf32>
    %222 = arith.mulf %221, %221 : vector<16x32xf32>
    %cst_67 = arith.constant dense<0.000000e+00> : vector<16xf32>
    %223 = vector.multi_reduction <add>, %222, %cst_67 [1] : vector<16x32xf32> to vector<16xf32>
    %224 = vector.shape_cast %223 : vector<16xf32> to vector<16x1xf32>
    %cst_68 = arith.constant 3.200000e+01 : f32
    %225 = vector.broadcast %cst_68 : f32 to vector<16x1xf32>
    %226 = arith.divf %224, %225 : vector<16x1xf32>
    %227 = vector.broadcast %219 : vector<16x1xf32> to vector<16x32xf32>
    %228 = arith.subf %213, %227 : vector<16x32xf32>
    %cst_69 = arith.constant 9.99999974E-6 : f32
    %229 = vector.broadcast %cst_69 : f32 to vector<16x1xf32>
    %230 = arith.addf %226, %229 : vector<16x1xf32>
    %231 = math.rsqrt %230 : vector<16x1xf32>
    %232 = vector.broadcast %231 : vector<16x1xf32> to vector<16x32xf32>
    %233 = arith.mulf %228, %232 : vector<16x32xf32>
    %234 = vector.broadcast %214 : vector<1x32xf32> to vector<16x32xf32>
    %235 = arith.mulf %233, %234 : vector<16x32xf32>
    %236 = vector.broadcast %215 : vector<1x32xf32> to vector<16x32xf32>
    %237 = arith.addf %235, %236 : vector<16x32xf32>
    %c0_70 = arith.constant 0 : index
    %c0_71 = arith.constant 0 : index
    %238 = vector.load %arg3[%c0_70, %c0_71] : memref<32x64xf32, #tpu.memory_space<vmem>>, vector<32x64xf32>
    %cst_72 = arith.constant dense<0.000000e+00> : vector<16x64xf32>
    %239 = tpu.matmul %237, %238, %cst_72 {dimension_numbers = #tpu.dot_dimension_numbers<[1], [0], [0], [1], [0, 0, 1, 1], [], []>} : vector<16x32xf32>, vector<32x64xf32>, vector<16x64xf32> -> vector<16x64xf32>
    %240 = vector.extract_strided_slice %1 {offsets = [4, 0], sizes = [1, 64], strides = [1, 1]} : vector<9x128xf32> to vector<1x64xf32>
    %241 = vector.broadcast %240 : vector<1x64xf32> to vector<16x64xf32>
    %242 = arith.addf %239, %241 : vector<16x64xf32>
    %cst_73 = arith.constant 5.000000e-01 : f32
    %243 = vector.broadcast %cst_73 : f32 to vector<16x64xf32>
    %244 = arith.mulf %243, %242 : vector<16x64xf32>
    %cst_74 = arith.constant 0.707106769 : f32
    %245 = vector.broadcast %cst_74 : f32 to vector<16x64xf32>
    %246 = arith.mulf %242, %245 : vector<16x64xf32>
    %cst_75 = arith.constant 0.000000e+00 : f32
    %247 = vector.broadcast %cst_75 : f32 to vector<16x64xf32>
    %248 = arith.cmpf oge, %246, %247 : vector<16x64xf32>
    %cst_76 = arith.constant 1.000000e+00 : f32
    %cst_77 = arith.constant -1.000000e+00 : f32
    %249 = vector.broadcast %cst_76 : f32 to vector<16x64xf32>
    %250 = vector.broadcast %cst_77 : f32 to vector<16x64xf32>
    %251 = arith.select %248, %249, %250 : vector<16x64xi1>, vector<16x64xf32>
    %252 = math.absf %246 : vector<16x64xf32>
    %cst_78 = arith.constant 0.327591091 : f32
    %253 = vector.broadcast %cst_78 : f32 to vector<16x64xf32>
    %254 = arith.mulf %253, %252 : vector<16x64xf32>
    %cst_79 = arith.constant 1.000000e+00 : f32
    %255 = vector.broadcast %cst_79 : f32 to vector<16x64xf32>
    %256 = arith.addf %255, %254 : vector<16x64xf32>
    %cst_80 = arith.constant 1.000000e+00 : f32
    %257 = vector.broadcast %cst_80 : f32 to vector<16x64xf32>
    %258 = arith.divf %257, %256 : vector<16x64xf32>
    %cst_81 = arith.constant 1.06140542 : f32
    %259 = vector.broadcast %cst_81 : f32 to vector<16x64xf32>
    %260 = arith.mulf %259, %258 : vector<16x64xf32>
    %cst_82 = arith.constant -1.45315206 : f32
    %261 = vector.broadcast %cst_82 : f32 to vector<16x64xf32>
    %262 = arith.addf %260, %261 : vector<16x64xf32>
    %263 = arith.mulf %262, %258 : vector<16x64xf32>
    %cst_83 = arith.constant 1.42141378 : f32
    %264 = vector.broadcast %cst_83 : f32 to vector<16x64xf32>
    %265 = arith.addf %263, %264 : vector<16x64xf32>
    %266 = arith.mulf %265, %258 : vector<16x64xf32>
    %cst_84 = arith.constant -0.284496725 : f32
    %267 = vector.broadcast %cst_84 : f32 to vector<16x64xf32>
    %268 = arith.addf %266, %267 : vector<16x64xf32>
    %269 = arith.mulf %268, %258 : vector<16x64xf32>
    %cst_85 = arith.constant 0.254829586 : f32
    %270 = vector.broadcast %cst_85 : f32 to vector<16x64xf32>
    %271 = arith.addf %269, %270 : vector<16x64xf32>
    %272 = arith.mulf %271, %258 : vector<16x64xf32>
    %cst_86 = arith.constant 0.000000e+00 : f32
    %273 = vector.broadcast %cst_86 : f32 to vector<16x64xf32>
    %274 = arith.subf %273, %252 : vector<16x64xf32>
    %275 = arith.mulf %274, %252 : vector<16x64xf32>
    %276 = math.exp %275 : vector<16x64xf32>
    %277 = arith.mulf %272, %276 : vector<16x64xf32>
    %cst_87 = arith.constant 1.000000e+00 : f32
    %278 = vector.broadcast %cst_87 : f32 to vector<16x64xf32>
    %279 = arith.subf %278, %277 : vector<16x64xf32>
    %280 = arith.mulf %251, %279 : vector<16x64xf32>
    %cst_88 = arith.constant 1.000000e+00 : f32
    %281 = vector.broadcast %cst_88 : f32 to vector<16x64xf32>
    %282 = arith.addf %281, %280 : vector<16x64xf32>
    %283 = arith.mulf %244, %282 : vector<16x64xf32>
    %284 = vector.extract_strided_slice %207 {offsets = [32, 0], sizes = [64, 32], strides = [1, 1]} : vector<96x32xf32> to vector<64x32xf32>
    %cst_89 = arith.constant dense<0.000000e+00> : vector<16x32xf32>
    %285 = tpu.matmul %283, %284, %cst_89 {dimension_numbers = #tpu.dot_dimension_numbers<[1], [0], [0], [1], [0, 0, 1, 1], [], []>} : vector<16x64xf32>, vector<64x32xf32>, vector<16x32xf32> -> vector<16x32xf32>
    %286 = vector.extract_strided_slice %1 {offsets = [5, 0], sizes = [1, 32], strides = [1, 1]} : vector<9x128xf32> to vector<1x32xf32>
    %287 = vector.broadcast %286 : vector<1x32xf32> to vector<16x32xf32>
    %288 = arith.addf %285, %287 : vector<16x32xf32>
    %289 = arith.addf %237, %288 : vector<16x32xf32>
    %290 = vector.extract_strided_slice %1 {offsets = [6, 0], sizes = [1, 32], strides = [1, 1]} : vector<9x128xf32> to vector<1x32xf32>
    %291 = vector.extract_strided_slice %1 {offsets = [7, 0], sizes = [1, 32], strides = [1, 1]} : vector<9x128xf32> to vector<1x32xf32>
    %cst_90 = arith.constant dense<0.000000e+00> : vector<16xf32>
    %292 = vector.multi_reduction <add>, %289, %cst_90 [1] : vector<16x32xf32> to vector<16xf32>
    %293 = vector.shape_cast %292 : vector<16xf32> to vector<16x1xf32>
    %cst_91 = arith.constant 3.200000e+01 : f32
    %294 = vector.broadcast %cst_91 : f32 to vector<16x1xf32>
    %295 = arith.divf %293, %294 : vector<16x1xf32>
    %296 = vector.broadcast %295 : vector<16x1xf32> to vector<16x32xf32>
    %297 = arith.subf %289, %296 : vector<16x32xf32>
    %298 = arith.mulf %297, %297 : vector<16x32xf32>
    %cst_92 = arith.constant dense<0.000000e+00> : vector<16xf32>
    %299 = vector.multi_reduction <add>, %298, %cst_92 [1] : vector<16x32xf32> to vector<16xf32>
    %300 = vector.shape_cast %299 : vector<16xf32> to vector<16x1xf32>
    %cst_93 = arith.constant 3.200000e+01 : f32
    %301 = vector.broadcast %cst_93 : f32 to vector<16x1xf32>
    %302 = arith.divf %300, %301 : vector<16x1xf32>
    %303 = vector.broadcast %295 : vector<16x1xf32> to vector<16x32xf32>
    %304 = arith.subf %289, %303 : vector<16x32xf32>
    %cst_94 = arith.constant 9.99999974E-6 : f32
    %305 = vector.broadcast %cst_94 : f32 to vector<16x1xf32>
    %306 = arith.addf %302, %305 : vector<16x1xf32>
    %307 = math.rsqrt %306 : vector<16x1xf32>
    %308 = vector.broadcast %307 : vector<16x1xf32> to vector<16x32xf32>
    %309 = arith.mulf %304, %308 : vector<16x32xf32>
    %310 = vector.broadcast %290 : vector<1x32xf32> to vector<16x32xf32>
    %311 = arith.mulf %309, %310 : vector<16x32xf32>
    %312 = vector.broadcast %291 : vector<1x32xf32> to vector<16x32xf32>
    %313 = arith.addf %311, %312 : vector<16x32xf32>
    %c0_95 = arith.constant 0 : index
    %c0_96 = arith.constant 0 : index
    %314 = vector.load %arg7[%c0_95, %c0_96] : memref<16x32xf32, #tpu.memory_space<vmem>>, vector<16x32xf32>
    tpu.vector_store %arg7[%c0_95, %c0_96], %313 {strides = array<i32>} : memref<16x32xf32, #tpu.memory_space<vmem>>, vector<16x32xf32>,
    return
  }
  func.func @transform_0(%arg0: i32) -> (i32, i32) {
    %c0_i32 = arith.constant 0 : i32
    %c0_i32_0 = arith.constant 0 : i32
    %c0_i32_1 = arith.constant 0 : i32
    return %c0_i32, %c0_i32_0 : i32, i32
  }
  func.func @transform_1(%arg0: i32) -> (i32, i32) {
    %c0_i32 = arith.constant 0 : i32
    %c0_i32_0 = arith.constant 0 : i32
    %c0_i32_1 = arith.constant 0 : i32
    return %c0_i32, %c0_i32_0 : i32, i32
  }
  func.func @transform_2(%arg0: i32) -> (i32, i32) {
    %c0_i32 = arith.constant 0 : i32
    %c0_i32_0 = arith.constant 0 : i32
    %c0_i32_1 = arith.constant 0 : i32
    return %c0_i32, %c0_i32_0 : i32, i32
  }
  func.func @transform_3(%arg0: i32) -> (i32, i32) {
    %c0_i32 = arith.constant 0 : i32
    %c0_i32_0 = arith.constant 0 : i32
    %c0_i32_1 = arith.constant 0 : i32
    return %c0_i32, %c0_i32_0 : i32, i32
  }
  func.func @transform_4(%arg0: i32) -> (i32, i32) {
    %c0_i32 = arith.constant 0 : i32
    %c0_i32_0 = arith.constant 0 : i32
    %c0_i32_1 = arith.constant 0 : i32
    return %c0_i32, %c0_i32_0 : i32, i32
  }
  func.func @transform_5(%arg0: i32) -> (i32, i32, i32) {
    %c0_i32 = arith.constant 0 : i32
    %c0_i32_0 = arith.constant 0 : i32
    %c0_i32_1 = arith.constant 0 : i32
    %c0_i32_2 = arith.constant 0 : i32
    return %c0_i32, %c0_i32_0, %c0_i32_1 : i32, i32, i32
  }
  func.func @transform_6(%arg0: i32) -> (i32, i32) {
    %c0_i32 = arith.constant 0 : i32
    %c0_i32_0 = arith.constant 0 : i32
    %c0_i32_1 = arith.constant 0 : i32
    return %c0_i32, %c0_i32_0 : i32, i32
  }
}

</mosaic_0001>

<bundles_post_ra>
// kernel: tpu_custom_call.1
= control target key start
LH: loop header
LB: loop body
LE: loop exit
PB: predicated region body
PF: predicated region fallthrough
CT: control target
= control target key end

     0   :  { %vm36_vm0 = vcmask 261120   ;;  %s2670_s0 = inlined_call_operand.vmem [shape: f32[16,32], index: 0, kind: input, shape index: {}]   ;;  %s2671_s1 = inlined_call_operand.vmem [shape: f32[32,104], index: 1, kind: input, shape index: {}]   ;;  %s2672_s2 = inlined_call_operand.vmem [shape: f32[32,64], index: 2, kind: input, shape index: {}]   ;;  %s2673_s3 = inlined_call_operand.vmem [shape: f32[96,32], index: 3, kind: input, shape index: {}]   ;;  %s2674_s4 = inlined_call_operand.vmem [shape: f32[9,128], index: 4, kind: input, shape index: {}]   ;;  %s2675_s5 = inlined_call_operand.vmem [shape: f32[4,8,8], index: 5, kind: input, shape index: {}]   ;;  %s2676_s6 = inlined_call_operand.hbm [shape: f32[16,32], index: 6, kind: output, shape index: {}]  }
   0x1   :  { %v31_v0 = vld [vmem:[%s2671_s1 + $0x18] sm:$0xff]  ;;  %v30_v1 = vld [vmem:[%s2671_s1 + $0x10] sm:$0xff]  ;;  %v2396_v2 = vld [vmem:[%s2670_s0] sm:$0xff] }
   0x2   :  { %2083 = vmatprep.subr.mxu1 %v31_v0  ;;  %v29_v3 = vld [vmem:[%s2671_s1 + $0x8] sm:$0xff]  ;;  %2091 = vmatprep.mubr.msk.f32.mxu1 %vm36_vm0, %v2396_v2 }
   0x3   :  { %2084 = vmatpush3.msra.mxu1 %v31_v0 }
   0x4   :  { %11 = vsyncpa [#allocation3], 0  ;;  %2085 = vmatprep.subr.mxu1 %v30_v1  ;;  %v28_v4 = vld [vmem:[%s2671_s1] sm:$0xff]  ;;  %v2409_v5 = vld [vmem:[%s2670_s0 + $0x8] sm:$0xff]  ;;  %v2327_v6 = vmov 0.0   ;;  %v32_v7 = vlaneseq  ;;  %vm2328_vm1 = vmmov 0  }
   0x5   :  { %2086 = vmatpush3.msra.mxu1 %v30_v1  ;;  %2104 = vmatprep.subr.mxu0 %v2327_v6  ;;  %v2425_v10 = vld [vmem:[%s2674_s4] sm:$0xff]  ;;  %s2329_s9 = smov 96   ;;  %s2330_s10 = smov 120   ;;  %v1987_v18 = vld [vmem:[%s2674_s4 + $0x8] ss:$0 sm:$0xff]  ;;  %vm166_vm2 = vcmask 64512  }
   0x6   :  { %2087 = vmatprep.subr.mxu1 %v29_v3  ;;  %v2415_v8 = vshrl.u32 %v32_v7, 7  ;;  %2106 = vmatprep.mubr.msk.f32.mxu0 %vm2328_vm1, %v2327_v6  ;;  %s2331_s11 = smov 88   ;;  %s2332_s12 = smov 80   ;;  %v2337_v36 = vmov 97   ;;  %v2338_v37 = vmov 96   ;;  %v2340_v54 = vmov 98  }
   0x7   :  { %2088 = vmatpush3.msra.mxu1 %v29_v3  ;;  %s2333_s13 = smov 112   ;;  %s2334_s14 = smov 72   ;;  %2241 = vset.pattern.permute.xlu0 %v2337_v36  ;;  %v2341_v55 = vmov 99   ;;  %vm858_vm3 = vcmask 130048   ;;  %vm860_vm4 = vcmask 195584   ;;  %vm1843_vm7 = vcmask 523264  }
   0x8   :  { %2089 = vmatprep.subr.mxu1 %v28_v4  ;;  %v34_v9 = vsub.s32 0, %v2415_v8  ;;  %s2335_s15 = smov 104   ;;  %s2336_s18 = smov 100   ;;  %2240 = vset.pattern.permute.xlu1 %v2338_v37 }
   0x9   :  { %2090 = vmatpush3.msra.mxu1 %v28_v4  ;;  %s2339_s19 = smov 124   ;;  %s2342_s20 = smov 64  }
   0xa   :  { %2092 = vmatmul.mubr.msk.f32.vlgmr.msra.gmra.mxu1 %vm36_vm0, %v2409_v5  ;;  %2094 = vmatprep.subr.mxu1 %v2327_v6  ;;  %v35_v12 = vrot.slane %v2425_v10, %v34_v9  ;;  %s2343_s21 = smov 56   ;;  %s2345_s30 = smov 48  }
   0xb   :  { %2096 = vmatprep.mubr.msk.f32.mxu1 %vm2328_vm1, %v2327_v6  ;;  %s2346_s7 = smov 8   ;;  %s2347_s8 = smov 16  }
   0xc   :  { %s2348_s0 = smov 24  }
  0xca   :  { %v2093_v11 = vpop.f32.mrf.mxu1 }
  0xcb   :  { %v2435_v16 = vadd.f32 %v2093_v11, %v35_v12 }
  0xcc   :  { %v109_v13 = vpop.f32.mrf.mxu1 }
  0xcd   :  { %v2428_v14 = vadd.f32 %v109_v13, %v35_v12  ;;  %v119_v17 = vmul.f32 0.35355338, %v2435_v16  ;;  %v1986_v19 = vmul.f32 -1.442695, %v2435_v16  ;;  %v1993_v13 = vld [vmem:[%s2675_s5 + $0x8] sm:$0xff] }
  0xcf   :  { %164 = vrot.lane.b32.xlu0 %v2428_v14, %s2329_s9  ;;  %v118_v15 = vmul.f32 0.35355338, %v2428_v14  ;;  %v1985_v20 = vmul.f32 -1.442695, %v2428_v14  ;;  %2248 = vpow2.f32 %v1986_v19 }
  0xd1   :  { %336 = vrot.lane.b32.xlu1 %v118_v15, %s2330_s10  ;;  %2250 = vpow2.f32 %v1985_v20 }
  0xd3   :  { %338 = vrot.lane.b32.xlu0 %v2428_v14, %s2331_s11 }
  0xd5   :  { %510 = vrot.lane.b32.xlu1 %v2428_v14, %s2332_s12 }
  0xd7   :  { %508 = vrot.lane.b32.xlu0 %v118_v15, %s2333_s13 }
  0xd9   :  { %682 = vrot.lane.b32.xlu1 %v2428_v14, %s2334_s14 }
  0xdb   :  { %680 = vrot.lane.b32.xlu0 %v118_v15, %s2335_s15 }
  0xdc   :  { %v2249_v25 = vpop.eup %2248 }
  0xdd   :  { %869 = vrot.lane.b32.xlu1 %v2435_v16, %s2329_s9  ;;  %v127_v29 = vadd.f32 1.0, %v2249_v25 }
  0xde   :  { %v2251_v26 = vpop.eup %2250 }
  0xdf   :  { %1040 = vrot.lane.b32.xlu0 %v2435_v16, %s2331_s11  ;;  %v126_v30 = vadd.f32 1.0, %v2251_v26  ;;  %2252 = vrcp.f32 %v127_v29 }
  0xe1   :  { %1038 = vrot.lane.b32.xlu1 %v119_v17, %s2330_s10  ;;  %2254 = vrcp.f32 %v126_v30  ;;  %v2001_v30 = vld [vmem:[%s2675_s5 + $0x18] sm:$0xff] }
  0xe3   :  { %1210 = vrot.lane.b32.xlu0 %v2435_v16, %s2332_s12 }
  0xe5   :  { %1208 = vrot.lane.b32.xlu1 %v119_v17, %s2333_s13 }
  0xe7   :  { %1380 = vrot.lane.b32.xlu0 %v2435_v16, %s2334_s14 }
  0xe9   :  { %1378 = vrot.lane.b32.xlu1 %v119_v17, %s2335_s15 }
  0xeb   :  { %137 = vrot.lane.b32.xlu0 %v1987_v18, %s2336_s18 }
  0xec   :  { %v2253_v40 = vpop.eup %2252 }
  0xee   :  { %v2255_v41 = vpop.eup %2254 }
 0x141   :  { %v165_v21 = vpop.permute.xlu0 %164 }
 0x142   :  { %2095 = vmatpush3.xpose.msk.msra.mxu1 %vm166_vm2, %v165_v21  ;;  %v1997_v21 = vld [vmem:[%s2675_s5 + $0x10] sm:$0xff] }
 0x143   :  { %v337_v22 = vpop.permute.xlu1 %336  ;;  %2099 = vmatprep.subr.mxu1 %v2327_v6 }
 0x145   :  { %v339_v23 = vpop.permute.xlu0 %338  ;;  %2097 = vmatmul.mubr.msk.f32.vlgmr.msra.gmra.mxu1 %vm166_vm2, %v118_v15  ;;  %v156_v15 = vld [vmem:[%s2675_s5] sm:$0xff]  ;;  %s2344_s5 = smov 40  }
 0x146   :  { %2105 = vmatpush3.xpose.msk.msra.mxu0 %vm166_vm2, %v339_v23  ;;  %2101 = vmatprep.mubr.msk.f32.mxu1 %vm2328_vm1, %v2327_v6 }
 0x147   :  { %v511_v24 = vpop.permute.xlu1 %510  ;;  %2114 = vmatprep.subr.mxu0 %v2327_v6 }
 0x149   :  { %v509_v27 = vpop.permute.xlu0 %508  ;;  %2107 = vmatmul.mubr.msk.f32.vlgmr.msra.gmra.mxu0 %vm166_vm2, %v337_v22 }
 0x14a   :  { %2115 = vmatpush3.xpose.msk.msra.mxu0 %vm166_vm2, %v511_v24  ;;  %2116 = vmatprep.mubr.msk.f32.mxu0 %vm2328_vm1, %v2327_v6 }
 0x14b   :  { %v683_v28 = vpop.permute.xlu1 %682  ;;  %2124 = vmatprep.subr.mxu0 %v2327_v6 }
 0x14d   :  { %v681_v31 = vpop.permute.xlu0 %680  ;;  %2117 = vmatmul.mubr.msk.f32.vlgmr.msra.gmra.mxu0 %vm166_vm2, %v509_v27 }
 0x14e   :  { %2125 = vmatpush3.xpose.msk.msra.mxu0 %vm166_vm2, %v683_v28  ;;  %2126 = vmatprep.mubr.msk.f32.mxu0 %vm2328_vm1, %v2327_v6 }
 0x14f   :  { %v870_v32 = vpop.permute.xlu1 %869  ;;  %2134 = vmatprep.subr.mxu0 %v2327_v6 }
 0x151   :  { %v1041_v33 = vpop.permute.xlu0 %1040  ;;  %2127 = vmatmul.mubr.msk.f32.vlgmr.msra.gmra.mxu0 %vm166_vm2, %v681_v31 }
 0x152   :  { %2135 = vmatpush3.xpose.msk.msra.mxu0 %vm166_vm2, %v870_v32  ;;  %2136 = vmatprep.mubr.msk.f32.mxu0 %vm2328_vm1, %v2327_v6 }
 0x153   :  { %2144 = vmatprep.subr.mxu0 %v2327_v6  ;;  %v1039_v34 = vpop.permute.xlu1 %1038 }
 0x155   :  { %v1211_v35 = vpop.permute.xlu0 %1210  ;;  %2137 = vmatmul.mubr.msk.f32.vlgmr.msra.gmra.mxu0 %vm166_vm2, %v119_v17 }
 0x156   :  { %2145 = vmatpush3.xpose.msk.msra.mxu0 %vm166_vm2, %v1041_v33  ;;  %2146 = vmatprep.mubr.msk.f32.mxu0 %vm2328_vm1, %v2327_v6 }
 0x157   :  { %2154 = vmatprep.subr.mxu0 %v2327_v6  ;;  %v1209_v39 = vpop.permute.xlu1 %1208 }
 0x159   :  { %v1381_v38 = vpop.permute.xlu0 %1380  ;;  %2147 = vmatmul.mubr.msk.f32.vlgmr.msra.gmra.mxu0 %vm166_vm2, %v1039_v34 }
 0x15a   :  { %2155 = vmatpush3.xpose.msk.msra.mxu0 %vm166_vm2, %v1211_v35  ;;  %2156 = vmatprep.mubr.msk.f32.mxu0 %vm2328_vm1, %v2327_v6 }
 0x15b   :  { %2164 = vmatprep.subr.mxu0 %v2327_v6  ;;  %v1379_v45 = vpop.permute.xlu1 %1378 }
 0x15d   :  { %v138_v42 = vpop.permute.xlu0 %137  ;;  %2157 = vmatmul.mubr.msk.f32.vlgmr.msra.gmra.mxu0 %vm166_vm2, %v1209_v39 }
 0x15e   :  { %v140_v43 = vmul.f32 %v2255_v41, %v138_v42  ;;  %v141_v44 = vmul.f32 %v2253_v40, %v138_v42  ;;  %2165 = vmatpush3.xpose.msk.msra.mxu0 %vm166_vm2, %v1381_v38  ;;  %2166 = vmatprep.mubr.msk.f32.mxu0 %vm2328_vm1, %v2327_v6 }
 0x160   :  { %v1988_v46 = vadd.f32 -1.0, %v140_v43  ;;  %v1989_v47 = vadd.f32 -1.0, %v141_v44 }
 0x161   :  { %2167 = vmatmul.mubr.msk.f32.vlgmr.msra.gmra.mxu0 %vm166_vm2, %v1379_v45 }
 0x162   :  { %148 = vrot.lane.b32.xlu0 %v1989_v47, %s2339_s19  ;;  %146 = vrot.lane.b32.xlu1 %v1988_v46, %s2339_s19 }
 0x1d4   :  { %v147_v48 = vpop.permute.xlu1 %146  ;;  %v149_v49 = vpop.permute.xlu0 %148 }
 0x1d5   :  { %v152_v50 = vmul.f32 %v2255_v41, %v147_v48  ;;  %v153_v52 = vmul.f32 %v2253_v40, %v149_v49 }
 0x1d7   :  { %v154_v51 = vadd.f32 2.0, %v152_v50  ;;  %v155_v53 = vadd.f32 2.0, %v153_v52 }
 0x1d9   :  { %332 = vperm.xlu0 %2241, %v154_v51   ;;  %159 = vperm.xlu1 %2240, %v154_v51  }
 0x1dd   :  { %2244 = vset.pattern.permute.xlu0 %v2338_v37  ;;  %2242 = vset.pattern.permute.xlu1 %v2340_v54 }
 0x1de   :  { %864 = vperm.xlu0 %2244, %v155_v53   ;;  %504 = vperm.xlu1 %2242, %v154_v51  }
 0x1e2   :  { %2247 = vset.pattern.permute.xlu0 %v2341_v55  ;;  %2243 = vset.pattern.permute.xlu1 %v2341_v55 }
 0x1e3   :  { %1374 = vperm.xlu0 %2247, %v155_v53   ;;  %676 = vperm.xlu1 %2243, %v154_v51  }
 0x1e7   :  { %253 = vrot.lane.b32.xlu0 %v2428_v14, %s2342_s20  ;;  %2245 = vset.pattern.permute.xlu1 %v2337_v36 }
 0x1e8   :  { %1034 = vperm.xlu1 %2245, %v155_v53  }
 0x1ec   :  { %2246 = vset.pattern.permute.xlu1 %v2340_v54 }
 0x1ed   :  { %1204 = vperm.xlu1 %2246, %v155_v53  }
 0x1f1   :  { %425 = vrot.lane.b32.xlu1 %v2428_v14, %s2343_s21 }
 0x205   :  { %v238_v56 = vpop.f32.mrf.mxu1 }
 0x207   :  { %v2098_v57 = vpop.f32.mrf.mxu1 }
 0x209   :  { %v410_v58 = vpop.f32.mrf.mxu0 }
 0x20b   :  { %v2108_v59 = vpop.f32.mrf.mxu0 }
 0x20d   :  { %v582_v60 = vpop.f32.mrf.mxu0 }
 0x20f   :  { %v2118_v61 = vpop.f32.mrf.mxu0 }
 0x211   :  { %v754_v62 = vpop.f32.mrf.mxu0 }
 0x213   :  { %v2128_v63 = vpop.f32.mrf.mxu0 }
 0x215   :  { %v942_v0 = vpop.f32.mrf.mxu0 }
 0x217   :  { %v2138_v1 = vpop.f32.mrf.mxu0 }
 0x219   :  { %v1112_v3 = vpop.f32.mrf.mxu0 }
 0x21b   :  { %v2148_v4 = vpop.f32.mrf.mxu0 }
 0x21d   :  { %v1282_v7 = vpop.f32.mrf.mxu0 }
 0x21f   :  { %v2158_v9 = vpop.f32.mrf.mxu0 }
 0x221   :  { %v1452_v11 = vpop.f32.mrf.mxu0 }
 0x223   :  { %v2168_v12 = vpop.f32.mrf.mxu0 }
 0x254   :  { %v333_v17 = vpop.permute.xlu0 %332  ;;  %v160_v18 = vpop.permute.xlu1 %159 }
 0x255   :  { %v335_v19 = vmul.f32 %v1993_v13, %v333_v17  ;;  %v162_v20 = vmul.f32 %v160_v18, %v156_v15 }
 0x257   :  { %v411_v22 = vadd.f32 %v410_v58, %v335_v19  ;;  %v239_v23 = vadd.f32 %v238_v56, %v162_v20 }
 0x259   :  { %v865_v24 = vpop.permute.xlu0 %864  ;;  %v505_v25 = vpop.permute.xlu1 %504  ;;  %v414_v26 = vsel %vm166_vm2, %v411_v22, -inf  ;;  %v242_v27 = vsel %vm166_vm2, %v239_v23, -inf }
 0x25a   :  { %v867_v28 = vmul.f32 %v865_v24, %v156_v15  ;;  %v507_v29 = vmul.f32 %v1997_v21, %v505_v25  ;;  %415 = vmax.xlane.f32.xlu0 %v414_v26  ;;  %243 = vmax.xlane.f32.xlu1 %v242_v27 }
 0x25c   :  { %v583_v31 = vadd.f32 %v582_v60, %v507_v29  ;;  %v2503_v35 = vadd.f32 %v942_v0, %v867_v28 }
 0x25e   :  { %v1375_v32 = vpop.permute.xlu0 %1374  ;;  %v677_v33 = vpop.permute.xlu1 %676  ;;  %v586_v34 = vsel %vm166_vm2, %v583_v31, -inf  ;;  %v946_v39 = vsel %vm166_vm2, %v2503_v35, -inf }
 0x25f   :  { %v679_v36 = vmul.f32 %v2001_v30, %v677_v33  ;;  %587 = vmax.xlane.f32.xlu1 %v586_v34  ;;  %v1377_v42 = vmul.f32 %v2001_v30, %v1375_v32 }
 0x261   :  { %v755_v37 = vadd.f32 %v754_v62, %v679_v36  ;;  %v1453_v47 = vadd.f32 %v1452_v11, %v1377_v42 }
 0x262   :  { %v254_v38 = vpop.permute.xlu0 %253 }
 0x263   :  { %v1035_v40 = vpop.permute.xlu1 %1034  ;;  %2100 = vmatpush3.msra.mxu1 %v254_v38  ;;  %947 = vmax.xlane.f32.xlu1 %v946_v39  ;;  %v758_v41 = vsel %vm166_vm2, %v755_v37, -inf  ;;  %v1456_v50 = vsel %vm166_vm2, %v1453_v47, -inf }
 0x264   :  { %v1037_v43 = vmul.f32 %v1993_v13, %v1035_v40  ;;  %759 = vmax.xlane.f32.xlu0 %v758_v41  ;;  %2109 = vmatprep.subr.mxu1 %v2327_v6 }
 0x266   :  { %v1113_v44 = vadd.f32 %v1112_v3, %v1037_v43 }
 0x268   :  { %v1205_v45 = vpop.permute.xlu1 %1204  ;;  %v1116_v46 = vsel %vm166_vm2, %v1113_v44, -inf }
 0x269   :  { %v1207_v48 = vmul.f32 %v1997_v21, %v1205_v45  ;;  %1117 = vmax.xlane.f32.xlu0 %v1116_v46 }
 0x26b   :  { %v1283_v49 = vadd.f32 %v1282_v7, %v1207_v48 }
 0x26c   :  { %v2516_v52 = vpop.permute.xlu1 %425 }
 0x26d   :  { %1457 = vmax.xlane.f32.xlu0 %v1456_v50  ;;  %v1286_v51 = vsel %vm166_vm2, %v1283_v49, -inf }
 0x26e   :  { %1287 = vmax.xlane.f32.xlu1 %v1286_v51 }
 0x27f   :  { %769 = vrot.lane.b32.xlu1 %v2428_v14, %s2344_s5 }
 0x283   :  { %597 = vrot.lane.b32.xlu0 %v2428_v14, %s2345_s30 }
 0x2e3   :  { %v416_v53 = vpop.xlane.xlu0 %415  ;;  %v244_v54 = vpop.xlane.xlu1 %243 }
 0x2e4   :  { %v417_v55 = vsub.f32 %v411_v22, %v416_v53  ;;  %v245_v56 = vsub.f32 %v239_v23, %v244_v54 }
 0x2e6   :  { %v418_v57 = vmul.f32 1.442695, %v417_v55  ;;  %v246_v58 = vmul.f32 1.442695, %v245_v56 }
 0x2e8   :  { %2256 = vpow2.f32 %v418_v57  ;;  %v588_v59 = vpop.xlane.xlu1 %587 }
 0x2e9   :  { %2258 = vpow2.f32 %v246_v58  ;;  %v589_v60 = vsub.f32 %v583_v31, %v588_v59 }
 0x2eb   :  { %v590_v61 = vmul.f32 1.442695, %v589_v60 }
 0x2ec   :  { %v948_v13 = vpop.xlane.xlu1 %947 }
 0x2ed   :  { %2260 = vpow2.f32 %v590_v61  ;;  %v760_v62 = vpop.xlane.xlu0 %759  ;;  %v949_v17 = vsub.f32 %v2503_v35, %v948_v13  ;;  %v1559_v13 = vld [vmem:[%s2673_s3 + $0x8] sm:$0xff] }
 0x2ee   :  { %v761_v63 = vsub.f32 %v755_v37, %v760_v62 }
 0x2ef   :  { %v950_v19 = vmul.f32 1.442695, %v949_v17 }
 0x2f0   :  { %v762_v0 = vmul.f32 1.442695, %v761_v63 }
 0x2f2   :  { %2262 = vpow2.f32 %v762_v0  ;;  %v1118_v15 = vpop.xlane.xlu0 %1117 }
 0x2f3   :  { %v1119_v21 = vsub.f32 %v1113_v44, %v1118_v15  ;;  %2264 = vpow2.f32 %v950_v19  ;;  %v1558_v15 = vld [vmem:[%s2673_s3] sm:$0xff] }
 0x2f5   :  { %v2257_v1 = vpop.eup %2256  ;;  %v1120_v25 = vmul.f32 1.442695, %v1119_v21 }
 0x2f6   :  { %v2259_v14 = vpop.eup %2258  ;;  %v420_v3 = vsel %vm166_vm2, %v2257_v1, 0.0  ;;  %v1458_v22 = vpop.xlane.xlu0 %1457 }
 0x2f7   :  { %421 = vadd.xlane.f32.xlu0 %v420_v3  ;;  %v248_v4 = vsel %vm166_vm2, %v2259_v14, 0.0  ;;  %v1288_v18 = vpop.xlane.xlu1 %1287  ;;  %v1459_v23 = vsub.f32 %v1453_v47, %v1458_v22 }
 0x2f8   :  { %249 = vadd.xlane.f32.xlu1 %v248_v4  ;;  %v1289_v20 = vsub.f32 %v1283_v49, %v1288_v18 }
 0x2f9   :  { %v1460_v26 = vmul.f32 1.442695, %v1459_v23 }
 0x2fa   :  { %v2261_v7 = vpop.eup %2260  ;;  %v1290_v24 = vmul.f32 1.442695, %v1289_v20  ;;  %v598_v35 = vpop.permute.xlu0 %597 }
 0x2fb   :  { %v592_v9 = vsel %vm166_vm2, %v2261_v7, 0.0  ;;  %v770_v36 = vpop.permute.xlu1 %769 }
 0x2fc   :  { %593 = vadd.xlane.f32.xlu1 %v592_v9  ;;  %2266 = vpow2.f32 %v1290_v24 }
 0x2fd   :  { %2268 = vpow2.f32 %v1120_v25 }
 0x2fe   :  { %2270 = vpow2.f32 %v1460_v26 }
 0x2ff   :  { %v2521_v11 = vpop.eup %2262 }
 0x300   :  { %v764_v12 = vsel %vm166_vm2, %v2521_v11, 0.0  ;;  %v2265_v27 = vpop.eup %2264 }
 0x301   :  { %765 = vadd.xlane.f32.xlu0 %v764_v12  ;;  %v952_v28 = vsel %vm166_vm2, %v2265_v27, 0.0  ;;  %v1560_v12 = vld [vmem:[%s2673_s3 + $0x10] sm:$0xff] }
 0x309   :  { %v2531_v29 = vpop.eup %2266 }
 0x30a   :  { %v2269_v30 = vpop.eup %2268  ;;  %v1292_v31 = vsel %vm166_vm2, %v2531_v29, 0.0 }
 0x30b   :  { %v2535_v32 = vpop.eup %2270  ;;  %v1122_v33 = vsel %vm166_vm2, %v2269_v30, 0.0 }
 0x30c   :  { %v1462_v34 = vsel %vm166_vm2, %v2535_v32, 0.0 }
 0x30d   :  { %1127 = vrot.lane.b32.xlu1 %v2435_v16, %s2343_s21 }
 0x317   :  { %957 = vrot.lane.b32.xlu0 %v2435_v16, %s2342_s20 }
 0x331   :  { %953 = vadd.xlane.f32.xlu1 %v952_v28 }
 0x335   :  { %1293 = vadd.xlane.f32.xlu1 %v1292_v31 }
 0x336   :  { %1123 = vadd.xlane.f32.xlu0 %v1122_v33 }
 0x339   :  { %1463 = vadd.xlane.f32.xlu1 %v1462_v34 }
 0x34a   :  { %1467 = vrot.lane.b32.xlu1 %v2435_v16, %s2344_s5 }
 0x34c   :  { %1297 = vrot.lane.b32.xlu0 %v2435_v16, %s2345_s30 }
 0x380   :  { %v422_v37 = vpop.xlane.xlu0 %421 }
 0x381   :  { %v250_v38 = vpop.xlane.xlu1 %249 }
 0x382   :  { %2272 = vrcp.f32 %v250_v38 }
 0x383   :  { %2274 = vrcp.f32 %v422_v37  ;;  %v1572_v37 = vsub.s32 1, %v2415_v8 }
 0x385   :  { %v594_v39 = vpop.xlane.xlu1 %593  ;;  %v1573_v38 = vrot.slane %v2425_v10, %v1572_v37 }
 0x386   :  { %2276 = vrcp.f32 %v594_v39 }
 0x389   :  { %v1128_v49 = vpop.permute.xlu1 %1127 }
 0x38a   :  { %v766_v40 = vpop.xlane.xlu0 %765 }
 0x38b   :  { %2278 = vrcp.f32 %v766_v40 }
 0x38e   :  { %v958_v48 = vpop.permute.xlu0 %957 }
 0x38f   :  { %v2273_v41 = vpop.eup %2272 }
 0x390   :  { %v252_v42 = vmul.f32 %v2273_v41, %v2259_v14  ;;  %v2275_v43 = vpop.eup %2274 }
 0x391   :  { %v424_v16 = vmul.f32 %v2275_v43, %v2257_v1 }
 0x392   :  { %2102 = vmatmul.mubr.msk.f32.vlgmr.msra.gmra.mxu1 %vm166_vm2, %v252_v42 }
 0x393   :  { %2110 = vmatpush3.msra.mxu1 %v2516_v52  ;;  %2111 = vmatprep.mubr.msk.f32.mxu1 %vm2328_vm1, %v2327_v6  ;;  %v2277_v44 = vpop.eup %2276 }
 0x394   :  { %2119 = vmatprep.subr.mxu1 %v2327_v6  ;;  %v596_v45 = vmul.f32 %v2277_v44, %v2261_v7 }
 0x396   :  { %2112 = vmatmul.mubr.msk.f32.vlgmr.msra.gmra.mxu1 %vm166_vm2, %v424_v16 }
 0x397   :  { %2120 = vmatpush3.msra.mxu1 %v598_v35  ;;  %2121 = vmatprep.mubr.msk.f32.mxu1 %vm2328_vm1, %v2327_v6 }
 0x398   :  { %2129 = vmatprep.subr.mxu1 %v2327_v6  ;;  %v2279_v46 = vpop.eup %2278 }
 0x399   :  { %v768_v47 = vmul.f32 %v2279_v46, %v2521_v11 }
 0x39a   :  { %2122 = vmatmul.mubr.msk.f32.vlgmr.msra.gmra.mxu1 %vm166_vm2, %v596_v45 }
 0x39b   :  { %2130 = vmatpush3.msra.mxu1 %v770_v36  ;;  %2131 = vmatprep.mubr.msk.f32.mxu1 %vm2328_vm1, %v2327_v6 }
 0x39c   :  { %2139 = vmatprep.subr.mxu1 %v2327_v6 }
 0x39e   :  { %2132 = vmatmul.mubr.msk.f32.vlgmr.msra.gmra.mxu1 %vm166_vm2, %v768_v47 }
 0x39f   :  { %2140 = vmatpush3.msra.mxu1 %v958_v48  ;;  %2141 = vmatprep.mubr.msk.f32.mxu1 %vm2328_vm1, %v2327_v6 }
 0x3a0   :  { %2149 = vmatprep.subr.mxu1 %v2327_v6 }
 0x3ba   :  { %v954_v50 = vpop.xlane.xlu1 %953 }
 0x3bb   :  { %2280 = vrcp.f32 %v954_v50 }
 0x3be   :  { %v1294_v51 = vpop.xlane.xlu1 %1293 }
 0x3bf   :  { %v1124_v52 = vpop.xlane.xlu0 %1123 }
 0x3c0   :  { %2282 = vrcp.f32 %v1124_v52 }
 0x3c1   :  { %2284 = vrcp.f32 %v1294_v51 }
 0x3c2   :  { %v1464_v53 = vpop.xlane.xlu1 %1463 }
 0x3c3   :  { %2286 = vrcp.f32 %v1464_v53  ;;  %v1298_v59 = vpop.permute.xlu0 %1297 }
 0x3c6   :  { %v1468_v62 = vpop.permute.xlu1 %1467 }
 0x3c8   :  { %v2281_v54 = vpop.eup %2280 }
 0x3c9   :  { %v956_v55 = vmul.f32 %v2281_v54, %v2265_v27 }
 0x3cb   :  { %2142 = vmatmul.mubr.msk.f32.vlgmr.msra.gmra.mxu1 %vm166_vm2, %v956_v55  ;;  %v1698_v55 = vld [vmem:[%s2672_s2 + $0x10] sm:$0xff] }
 0x3cc   :  { %2150 = vmatpush3.msra.mxu1 %v1128_v49  ;;  %2151 = vmatprep.mubr.msk.f32.mxu1 %vm2328_vm1, %v2327_v6 }
 0x3cd   :  { %v2283_v56 = vpop.eup %2282  ;;  %2159 = vmatprep.subr.mxu1 %v2327_v6 }
 0x3ce   :  { %v1126_v57 = vmul.f32 %v2283_v56, %v2269_v30  ;;  %v2285_v58 = vpop.eup %2284  ;;  %v1697_v56 = vld [vmem:[%s2672_s2 + $0x8] sm:$0xff] }
 0x3cf   :  { %v1296_v60 = vmul.f32 %v2285_v58, %v2531_v29 }
 0x3d0   :  { %2152 = vmatmul.mubr.msk.f32.vlgmr.msra.gmra.mxu1 %vm166_vm2, %v1126_v57  ;;  %v2287_v61 = vpop.eup %2286  ;;  %v1696_v57 = vld [vmem:[%s2672_s2] sm:$0xff] }
 0x3d1   :  { %2160 = vmatpush3.msra.mxu1 %v1298_v59  ;;  %2161 = vmatprep.mubr.msk.f32.mxu1 %vm2328_vm1, %v2327_v6  ;;  %v1466_v63 = vmul.f32 %v2287_v61, %v2535_v32 }
 0x3d2   :  { %2169 = vmatprep.subr.mxu1 %v2327_v6 }
 0x3d4   :  { %2162 = vmatmul.mubr.msk.f32.vlgmr.msra.gmra.mxu1 %vm166_vm2, %v1296_v60 }
 0x3d5   :  { %2170 = vmatpush3.msra.mxu1 %v1468_v62  ;;  %2171 = vmatprep.mubr.msk.f32.mxu1 %vm2328_vm1, %v2327_v6  ;;  %v1561_v6 = vld [vmem:[%s2673_s3 + $0x18] sm:$0xff] }
 0x3d6   :  { %2174 = vmatprep.subr.mxu0 %v1561_v6 }
 0x3d7   :  { %2175 = vmatpush3.msra.mxu0 %v1561_v6 }
 0x3d8   :  { %2172 = vmatmul.mubr.msk.f32.vlgmr.msra.gmra.mxu1 %vm166_vm2, %v1466_v63  ;;  %2176 = vmatprep.subr.mxu0 %v1560_v12 }
 0x3d9   :  { %2177 = vmatpush3.msra.mxu0 %v1560_v12 }
 0x3da   :  { %2178 = vmatprep.subr.mxu0 %v1559_v13 }
 0x3db   :  { %2179 = vmatpush3.msra.mxu0 %v1559_v13 }
 0x3dc   :  { %2180 = vmatprep.subr.mxu0 %v1558_v15 }
 0x3dd   :  { %2181 = vmatpush3.msra.mxu0 %v1558_v15 }
 0x452   :  { %v325_v0 = vpop.f32.mrf.mxu1 }
 0x454   :  { %v2103_v1 = vpop.f32.mrf.mxu1 }
 0x455   :  { %v1692_v1 = vsub.s32 3, %v2415_v8 }
 0x456   :  { %v497_v14 = vpop.f32.mrf.mxu1 }
 0x457   :  { %846 = vrot.lane.b32.xlu0 %v497_v14, %s2346_s7 }
 0x458   :  { %v2113_v3 = vpop.f32.mrf.mxu1 }
 0x45a   :  { %v669_v4 = vpop.f32.mrf.mxu1 }
 0x45b   :  { %850 = vrot.lane.b32.xlu1 %v669_v4, %s2347_s8 }
 0x45c   :  { %v2123_v7 = vpop.f32.mrf.mxu1 }
 0x45d   :  { %v1693_v7 = vrot.slane %v2425_v10, %v1692_v1  ;;  %v2349_v1 = vmov -1.0  }
 0x45e   :  { %v841_v9 = vpop.f32.mrf.mxu1 }
 0x45f   :  { %854 = vrot.lane.b32.xlu1 %v841_v9, %s2348_s0 }
 0x460   :  { %v2133_v11 = vpop.f32.mrf.mxu1 }
 0x48b   :  { %v1029_v17 = vpop.f32.mrf.mxu1 }
 0x48d   :  { %v2143_v18 = vpop.f32.mrf.mxu1 }
 0x48e   :  { %v1568_v18 = vld [vmem:[%s2673_s3 + $0x50] sm:$0xff] }
 0x490   :  { %v1199_v19 = vpop.f32.mrf.mxu1 }
 0x491   :  { %1544 = vrot.lane.b32.xlu0 %v1199_v19, %s2346_s7  ;;  %v1567_v19 = vld [vmem:[%s2673_s3 + $0x48] sm:$0xff] }
 0x492   :  { %v2153_v20 = vpop.f32.mrf.mxu1 }
 0x493   :  { %v1566_v20 = vld [vmem:[%s2673_s3 + $0x40] sm:$0xff] }
 0x494   :  { %v1369_v21 = vpop.f32.mrf.mxu1 }
 0x495   :  { %1548 = vrot.lane.b32.xlu0 %v1369_v21, %s2347_s8  ;;  %v1565_v21 = vld [vmem:[%s2673_s3 + $0x38] sm:$0xff] }
 0x496   :  { %v2163_v22 = vpop.f32.mrf.mxu1 }
 0x497   :  { %v1564_v22 = vld [vmem:[%s2673_s3 + $0x30] sm:$0xff] }
 0x498   :  { %v1539_v23 = vpop.f32.mrf.mxu1 }
 0x499   :  { %1552 = vrot.lane.b32.xlu1 %v1539_v23, %s2348_s0  ;;  %v1563_v23 = vld [vmem:[%s2673_s3 + $0x28] sm:$0xff] }
 0x49a   :  { %v2173_v24 = vpop.f32.mrf.mxu1 }
 0x49b   :  { %v1562_v24 = vld [vmem:[%s2673_s3 + $0x20] sm:$0xff] }
 0x4c9   :  { %v847_v25 = vpop.permute.xlu0 %846 }
 0x4ca   :  { %v857_v27 = vsel %vm166_vm2, %v325_v0, %v847_v25  ;;  %v1686_v0 = vsub.s32 2, %v2415_v8  ;;  %v1702_v25 = vsub.s32 4, %v2415_v8 }
 0x4cc   :  { %v1687_v14 = vrot.slane %v2425_v10, %v1686_v0 }
 0x4cd   :  { %v851_v26 = vpop.permute.xlu1 %850 }
 0x4ce   :  { %v859_v28 = vsel %vm858_vm3, %v857_v27, %v851_v26  ;;  %v1703_v26 = vrot.slane %v2425_v10, %v1702_v25 }
 0x4d1   :  { %v855_v29 = vpop.permute.xlu1 %854 }
 0x4d2   :  { %v861_v30 = vsel %vm860_vm4, %v859_v28, %v855_v29 }
 0x4d3   :  { %2182 = vmatprep.mubr.msk.f32.mxu0 %vm36_vm0, %v861_v30 }
 0x503   :  { %v1545_v31 = vpop.permute.xlu0 %1544 }
 0x504   :  { %v1555_v33 = vsel %vm166_vm2, %v1029_v17, %v1545_v31  ;;  %v1569_v17 = vld [vmem:[%s2673_s3 + $0x58] sm:$0xff] }
 0x505   :  { %2196 = vmatprep.subr.mxu0 %v1569_v17 }
 0x507   :  { %v1549_v32 = vpop.permute.xlu0 %1548 }
 0x508   :  { %v1556_v34 = vsel %vm858_vm3, %v1555_v33, %v1549_v32 }
 0x50b   :  { %v1553_v35 = vpop.permute.xlu1 %1552 }
 0x50c   :  { %v1557_v36 = vsel %vm860_vm4, %v1556_v34, %v1553_v35 }
 0x50d   :  { %2183 = vmatmul.mubr.msk.f32.vlgmr.msra.gmra.mxu0 %vm36_vm0, %v1557_v36 }
 0x50e   :  { %2197 = vmatpush3.msra.mxu0 %v1569_v17 }
 0x50f   :  { %2198 = vmatprep.subr.mxu0 %v1568_v18 }
 0x510   :  { %2199 = vmatpush3.msra.mxu0 %v1568_v18 }
 0x511   :  { %2200 = vmatprep.subr.mxu0 %v1567_v19 }
 0x512   :  { %2201 = vmatpush3.msra.mxu0 %v1567_v19 }
 0x513   :  { %2202 = vmatprep.subr.mxu0 %v1566_v20 }
 0x514   :  { %2203 = vmatpush3.msra.mxu0 %v1566_v20 }
 0x515   :  { %2204 = vmatprep.subr.mxu0 %v1565_v21 }
 0x516   :  { %2205 = vmatpush3.msra.mxu0 %v1565_v21  ;;  %v1841_v21 = vsub.s32 5, %v2415_v8 }
 0x517   :  { %2206 = vmatprep.subr.mxu0 %v1564_v22 }
 0x518   :  { %2207 = vmatpush3.msra.mxu0 %v1564_v22  ;;  %v2304_v22 = vld [vmem:[%s2674_s4] sm:$0xff]  ;;  %s2350_s4 = smov [#allocation2]  }
 0x519   :  { %2208 = vmatprep.subr.mxu0 %v1563_v23  ;;  %s1972_s14 = sshll.u32 %s2350_s4, 4  ;;  %s1973_s14 = int_to_ptr.vmem [resolvable:$true] %s1972_s14 }
 0x51a   :  { %2209 = vmatpush3.msra.mxu0 %v1563_v23  ;;  %v1842_v23 = vrot.slane %v2304_v22, %v1841_v21  ;;  %s2305_s15 = scalar_lea.vmem %s1973_s14, 256  ;;  %p2310_p1 = scmp.lt.s32.totalorder %s1973_s14, %s1973_s14 }
 0x51b   :  { %2210 = vmatprep.subr.mxu0 %v1562_v24  ;;  %p2306_p0 = scmp.ne.s32.totalorder %s1973_s14, %s2305_s15  ;;  %p2311_p2 = scmp.lt.s32.totalorder %s2305_s15, %s2305_s15 }
 0x51c   :  { %2211 = vmatpush3.msra.mxu0 %v1562_v24 }
 0x51d   :  { %p2312_p3 = por %p2311_p2, %p2310_p1 }
 0x51f   :  { %p2313_p4 = pnand %p2312_p3, %p2306_p0 }
 0x5cd   :  { %v2184_v39 = vpop.f32.mrf.mxu0 }
 0x5ce   :  { %v1652_v40 = vadd.f32 %v2184_v39, %v1573_v38 }
 0x5cf   :  { %v1646_v41 = vpop.f32.mrf.mxu0 }
 0x5d0   :  { %v1647_v42 = vadd.f32 %v1646_v41, %v1573_v38  ;;  %v1656_v43 = vadd.f32 %v1652_v40, %v2409_v5 }
 0x5d2   :  { %v1660_v16 = vsel %vm36_vm0, %v1656_v43, 0.0  ;;  %v1655_v44 = vadd.f32 %v1647_v42, %v2396_v2  ;;  %v1699_v2 = vld [vmem:[%s2672_s2 + $0x18] sm:$0xff] }
 0x5d3   :  { %1661 = vadd.xlane.f32.xlu1 %v1660_v16  ;;  %2185 = vmatprep.subr.mxu1 %v1699_v2 }
 0x5d4   :  { %v1657_v45 = vsel %vm36_vm0, %v1655_v44, 0.0  ;;  %2186 = vmatpush3.msra.mxu1 %v1699_v2 }
 0x5d5   :  { %1658 = vadd.xlane.f32.xlu0 %v1657_v45  ;;  %2187 = vmatprep.subr.mxu1 %v1698_v55 }
 0x5d6   :  { %2188 = vmatpush3.msra.mxu1 %v1698_v55 }
 0x5d7   :  { %2189 = vmatprep.subr.mxu1 %v1697_v56 }
 0x5d8   :  { %2190 = vmatpush3.msra.mxu1 %v1697_v56 }
 0x5d9   :  { %2191 = vmatprep.subr.mxu1 %v1696_v57 }
 0x5da   :  { %2192 = vmatpush3.msra.mxu1 %v1696_v57 }
 0x65c   :  { %v1662_v46 = vpop.xlane.xlu1 %1661 }
 0x65d   :  { %v1665_v47 = vmul.f32 0.03125, %v1662_v46 }
 0x65e   :  { %v1659_v48 = vpop.xlane.xlu0 %1658 }
 0x65f   :  { %v1664_v49 = vmul.f32 0.03125, %v1659_v48  ;;  %v1667_v50 = vsub.f32 %v1656_v43, %v1665_v47 }
 0x661   :  { %v1666_v51 = vsub.f32 %v1655_v44, %v1664_v49  ;;  %v1669_v54 = vmul.f32 %v1667_v50, %v1667_v50 }
 0x663   :  { %v1668_v52 = vmul.f32 %v1666_v51, %v1666_v51  ;;  %v1673_v5 = vsel %vm36_vm0, %v1669_v54, 0.0 }
 0x665   :  { %v1670_v53 = vsel %vm36_vm0, %v1668_v52, 0.0 }
 0x666   :  { %1671 = vadd.xlane.f32.xlu0 %v1670_v53 }
 0x66a   :  { %1674 = vadd.xlane.f32.xlu0 %v1673_v5 }
 0x6ef   :  { %v1672_v58 = vpop.xlane.xlu0 %1671 }
 0x6f0   :  { %v1676_v59 = vmul.f32 0.03125, %v1672_v58 }
 0x6f2   :  { %v1678_v60 = vadd.f32 1e-05, %v1676_v59 }
 0x6f3   :  { %v1675_v61 = vpop.xlane.xlu0 %1674 }
 0x6f4   :  { %2288 = vrsqrt.f32 %v1678_v60  ;;  %v1677_v62 = vmul.f32 0.03125, %v1675_v61 }
 0x6f6   :  { %v1679_v63 = vadd.f32 1e-05, %v1677_v62 }
 0x6f8   :  { %2290 = vrsqrt.f32 %v1679_v63 }
 0x701   :  { %v2289_v3 = vpop.eup %2288 }
 0x702   :  { %v1682_v4 = vmul.f32 %v2289_v3, %v1666_v51 }
 0x704   :  { %v1688_v9 = vmul.f32 %v1687_v14, %v1682_v4 }
 0x705   :  { %v2291_v11 = vpop.eup %2290 }
 0x706   :  { %v1683_v6 = vmul.f32 %v2291_v11, %v1667_v50  ;;  %v2618_v12 = vadd.f32 %v1693_v7, %v1688_v9 }
 0x708   :  { %v1689_v13 = vmul.f32 %v1687_v14, %v1683_v6  ;;  %2193 = vmatprep.mubr.msk.f32.mxu1 %vm36_vm0, %v2618_v12 }
 0x70a   :  { %v2622_v15 = vadd.f32 %v1693_v7, %v1689_v13 }
 0x70c   :  { %2194 = vmatmul.mubr.msk.f32.vlgmr.msra.gmra.mxu1 %vm36_vm0, %v2622_v15 }
 0x7cc   :  { %v2195_v27 = vpop.f32.mrf.mxu1 }
 0x7cd   :  { %v1782_v28 = vadd.f32 %v2195_v27, %v1703_v26 }
 0x7ce   :  { %v1776_v29 = vpop.f32.mrf.mxu1 }
 0x7cf   :  { %v1788_v30 = vmul.f32 0.70710677, %v1782_v28  ;;  %v1777_v31 = vadd.f32 %v1776_v29, %v1703_v26  ;;  %v1786_v18 = vmul.f32 0.5, %v1782_v28 }
 0x7d1   :  { %v1794_v32 = vand.u32 2147483647, %v1788_v30  ;;  %v1787_v33 = vmul.f32 0.70710677, %v1777_v31  ;;  %vm1790_vm5 = vcmp.ge.f32.partialorder %v1788_v30, 0.0  ;;  %v1785_v13 = vmul.f32 0.5, %v1777_v31 }
 0x7d2   :  { %v1792_v14 = vsel %vm1790_vm5, 1.0, %v2349_v1 }
 0x7d3   :  { %v1796_v34 = vmul.f32 0.3275911, %v1794_v32  ;;  %v1793_v35 = vand.u32 2147483647, %v1787_v33  ;;  %v1822_v39 = vsub.f32 0.0, %v1794_v32  ;;  %vm1789_vm6 = vcmp.ge.f32.partialorder %v1787_v33, 0.0 }
 0x7d4   :  { %v1791_v9 = vsel %vm1789_vm6, 1.0, %v2349_v1 }
 0x7d5   :  { %v1798_v36 = vadd.f32 1.0, %v1796_v34  ;;  %v1795_v37 = vmul.f32 0.3275911, %v1793_v35  ;;  %v1821_v40 = vsub.f32 0.0, %v1793_v35  ;;  %v1824_v41 = vmul.f32 %v1822_v39, %v1794_v32 }
 0x7d7   :  { %2292 = vrcp.f32 %v1798_v36  ;;  %v1797_v38 = vadd.f32 1.0, %v1795_v37  ;;  %v1823_v43 = vmul.f32 %v1821_v40, %v1793_v35  ;;  %v1827_v16 = vmul.f32 1.442695, %v1824_v41 }
 0x7d9   :  { %2294 = vrcp.f32 %v1797_v38  ;;  %v1825_v47 = vmul.f32 1.442695, %v1823_v43 }
 0x7da   :  { %2296 = vpow2.f32 %v1827_v16 }
 0x7db   :  { %2298 = vpow2.f32 %v1825_v47 }
 0x7e4   :  { %v2293_v42 = vpop.eup %2292 }
 0x7e5   :  { %v1804_v10 = vmul.f32 1.0614054, %v2293_v42 }
 0x7e6   :  { %v2295_v44 = vpop.eup %2294 }
 0x7e7   :  { %v1806_v45 = vadd.f32 -1.4531521, %v1804_v10  ;;  %v1803_v46 = vmul.f32 1.0614054, %v2295_v44  ;;  %v2297_v59 = vpop.eup %2296 }
 0x7e8   :  { %v2299_v63 = vpop.eup %2298 }
 0x7e9   :  { %v1808_v48 = vmul.f32 %v2293_v42, %v1806_v45  ;;  %v1805_v49 = vadd.f32 -1.4531521, %v1803_v46  ;;  %v1961_v45 = vsub.s32 7, %v2415_v8 }
 0x7eb   :  { %v1810_v50 = vadd.f32 1.4214138, %v1808_v48  ;;  %v1807_v51 = vmul.f32 %v2295_v44, %v1805_v49  ;;  %v1962_v49 = vrot.slane %v2304_v22, %v1961_v45 }
 0x7ed   :  { %v1812_v52 = vmul.f32 %v2293_v42, %v1810_v50  ;;  %v1809_v53 = vadd.f32 1.4214138, %v1807_v51 }
 0x7ef   :  { %v1814_v54 = vadd.f32 -0.28449672, %v1812_v52  ;;  %v1811_v5 = vmul.f32 %v2295_v44, %v1809_v53 }
 0x7f1   :  { %v1816_v2 = vmul.f32 %v2293_v42, %v1814_v54  ;;  %v1813_v55 = vadd.f32 -0.28449672, %v1811_v5 }
 0x7f3   :  { %v1818_v56 = vadd.f32 0.2548296, %v1816_v2  ;;  %v1815_v57 = vmul.f32 %v2295_v44, %v1813_v55 }
 0x7f5   :  { %v1820_v58 = vmul.f32 %v2293_v42, %v1818_v56  ;;  %v1817_v60 = vadd.f32 0.2548296, %v1815_v57 }
 0x7f7   :  { %v1830_v61 = vmul.f32 %v2297_v59, %v1820_v58  ;;  %v1819_v62 = vmul.f32 %v2295_v44, %v1817_v60  ;;  %v1955_v44 = vsub.s32 6, %v2415_v8 }
 0x7f9   :  { %v1832_v0 = vsub.f32 1.0, %v1830_v61  ;;  %v1829_v3 = vmul.f32 %v2299_v63, %v1819_v62  ;;  %v1956_v46 = vrot.slane %v2304_v22, %v1955_v44 }
 0x7fb   :  { %v1834_v4 = vmul.f32 %v1832_v0, %v1792_v14  ;;  %v1831_v7 = vsub.f32 1.0, %v1829_v3 }
 0x7fd   :  { %v1833_v11 = vmul.f32 %v1831_v7, %v1791_v9  ;;  %v1836_v6 = vadd.f32 1.0, %v1834_v4 }
 0x7ff   :  { %v1835_v17 = vadd.f32 1.0, %v1833_v11  ;;  %v1838_v20 = vmul.f32 %v1836_v6, %v1786_v18 }
 0x801   :  { %v1837_v19 = vmul.f32 %v1835_v17, %v1785_v13 }
 0x803   :  { %2212 = vmatprep.mubr.msk.f32.mxu0 %vm1843_vm7, %v1837_v19 }
 0x804   :  { %2213 = vmatmul.mubr.msk.f32.vlgmr.msra.gmra.mxu0 %vm1843_vm7, %v1838_v20 }
 0x8c4   :  { %v2214_v24 = vpop.f32.mrf.mxu0 }
 0x8c5   :  { %v1922_v25 = vadd.f32 %v2214_v24, %v1842_v23 }
 0x8c6   :  { %v1916_v26 = vpop.f32.mrf.mxu0 }
 0x8c7   :  { %v1917_v27 = vadd.f32 %v1916_v26, %v1842_v23  ;;  %v1926_v29 = vadd.f32 %v1922_v25, %v2622_v15 }
 0x8c9   :  { %v1930_v28 = vsel %vm36_vm0, %v1926_v29, 0.0  ;;  %v1925_v30 = vadd.f32 %v1917_v27, %v2618_v12 }
 0x8ca   :  { %1931 = vadd.xlane.f32.xlu0 %v1930_v28 }
 0x8cb   :  { %v1927_v31 = vsel %vm36_vm0, %v1925_v30, 0.0 }
 0x8cc   :  { %1928 = vadd.xlane.f32.xlu1 %v1927_v31 }
 0x953   :  { %v1932_v32 = vpop.xlane.xlu0 %1931 }
 0x954   :  { %v1934_v33 = vmul.f32 0.03125, %v1932_v32 }
 0x955   :  { %v1929_v34 = vpop.xlane.xlu1 %1928 }
 0x956   :  { %v1936_v35 = vsub.f32 %v1926_v29, %v1934_v33  ;;  %v1933_v36 = vmul.f32 0.03125, %v1929_v34 }
 0x958   :  { %v1935_v37 = vsub.f32 %v1925_v30, %v1933_v36  ;;  %v1938_v38 = vmul.f32 %v1936_v35, %v1936_v35 }
 0x95a   :  { %v1942_v39 = vsel %vm36_vm0, %v1938_v38, 0.0  ;;  %v1937_v40 = vmul.f32 %v1935_v37, %v1935_v37 }
 0x95b   :  { %1943 = vadd.xlane.f32.xlu0 %v1942_v39 }
 0x95c   :  { %v1939_v15 = vsel %vm36_vm0, %v1937_v40, 0.0 }
 0x95d   :  { %1940 = vadd.xlane.f32.xlu1 %v1939_v15 }
 0x9e4   :  { %v1944_v41 = vpop.xlane.xlu0 %1943 }
 0x9e5   :  { %v1946_v12 = vmul.f32 0.03125, %v1944_v41 }
 0x9e6   :  { %v1941_v42 = vpop.xlane.xlu1 %1940 }
 0x9e7   :  { %v1948_v43 = vadd.f32 1e-05, %v1946_v12  ;;  %v1945_v10 = vmul.f32 0.03125, %v1941_v42 }
 0x9e9   :  { %2300 = vrsqrt.f32 %v1948_v43  ;;  %v1947_v16 = vadd.f32 1e-05, %v1945_v10 }
 0x9eb   :  { %2302 = vrsqrt.f32 %v1947_v16 }
 0x9f6   :  { %v2301_v47 = vpop.eup %2300 }
 0x9f7   :  { %v1952_v48 = vmul.f32 %v2301_v47, %v1936_v35 }
 0x9f8   :  { %v2303_v50 = vpop.eup %2302 }
 0x9f9   :  { %v1951_v51 = vmul.f32 %v2303_v50, %v1935_v37  ;;  %v1958_v52 = vmul.f32 %v1956_v46, %v1952_v48 }
 0x9fb   :  { %v1957_v53 = vmul.f32 %v1956_v46, %v1951_v51  ;;  %v1964_v54 = vadd.f32 %v1962_v49, %v1958_v52 }
 0x9fd   :  { %v1963_v5 = vadd.f32 %v1962_v49, %v1957_v53  ;;  %1966 = vst.msk [vmem:[#allocation2 + $0x8] sm:$0xff] %vm36_vm0, %v1964_v54 }
 0x9ff   :  { %1965 = vst.msk [vmem:[#allocation2] sm:$0xff] %vm36_vm0, %v1963_v5 }
 0xa00   :  { %2316 = shalt.err (!%p2313_p4)
}
 0xa01   :  { %s2351_s16 = smov 128  }
 0xa02   :  { %1978 = dma.vmem_to_hbm [thread:$0]  %s1973_s14, 256, %s2676_s6, [#allocation3], %s2351_s16, %s2351_s16, %s2346_s7  }
 0xa03   :  { %2325 = dma.done.wait [#allocation3], 256  }
 0xa04   :  { %2326 = vsyncadd [#allocation3], 4294967040 }
 0xa05   :  { %1982 = vsyncpa [#allocation3], 1 }

</bundles_post_ra>
